<compile_context>
chip_gen: v6e
topology: v6e:2x2x1
jax: 0.10.0
libtpu: 0.0.40
codegen_flags: <defaults>
</compile_context>

<pallas_src>
import jax
import jax.numpy as jnp
import numpy as np
from jax import lax
from jax.experimental import pallas as pl
from jax.experimental.pallas import tpu as pltpu


def stdatt_lstm_kernel(
    x_ref,        # (S, I)    input sequence (batch squeezed)
    wih_e_ref,    # (I, 4H)   encoder W_ih^T, gate cols [i, f, o, g]
    whh_e_ref,    # (H, 4H)   encoder W_hh^T, gate cols [i, f, o, g]
    b_e_ref,      # (1, 4H)   encoder b_ih + b_hh, same gate order
    w_eout_ref,   # (H, 5H)   concat([W_ih_d^T, att_eh.weight^T], axis=1)
    b_eout_ref,   # (1, 5H)   concat([zeros(4H), att_eh.b + att_ch.b + att_bias])
    v2s_ref,      # (1, H)    att_v2s.weight (row vector)
    w_ctx_ref,    # (H, 5H)   concat([W_hh_d^T, att_ch.weight^T], axis=1)
    b_d_ref,      # (1, 4H)   decoder b_ih + b_hh, gate cols [i, f, o, g]
    out_ref,      # (S, H)    output sequence (batch squeezed)
):
    S = x_ref.shape[0]
    H = whh_e_ref.shape[0]
    H3 = 3 * H
    H4 = 4 * H

    def gate_nonlin(gates, c):
        # gate column order [i, f, o, g]: one sigmoid over 3H, one tanh over H.
        sg = jax.nn.sigmoid(gates[:, 0:H3])
        g = jnp.tanh(gates[:, H3:])
        i_g = sg[:, 0:H]
        f_g = sg[:, H:2 * H]
        o_g = sg[:, 2 * H:H3]
        c_new = f_g * c + i_g * g
        h_new = o_g * jnp.tanh(c_new)
        return h_new, c_new

    # ---- encoder: input projection hoisted into one (S,I)@(I,4H) matmul ----
    x_proj = (jnp.dot(x_ref[...], wih_e_ref[...],
                      preferred_element_type=jnp.float32)
              + b_e_ref[...])                               # (S, 4H)
    whh_e = whh_e_ref[...]

    h = jnp.zeros((1, H), jnp.float32)
    c = jnp.zeros((1, H), jnp.float32)
    e_rows = []
    for t in range(S):   # fully unrolled; static slices, no per-row VMEM stores
        gates = x_proj[t:t + 1, :] + jnp.dot(
            h, whh_e, preferred_element_type=jnp.float32)
        h, c = gate_nonlin(gates, c)
        e_rows.append(h)
    e_out = jnp.concatenate(e_rows, axis=0)                 # (S, H), in vregs

    # ---- hoisted e_out projections (attention + decoder input), one matmul --
    # columns: [0:4H] = P = e_out @ W_ih_d^T, [4H:5H] = eh_proj (biases folded)
    proj = (jnp.dot(e_out, w_eout_ref[...],
                    preferred_element_type=jnp.float32)
            + b_eout_ref[...])                              # (S, 5H)
    P = proj[:, 0:H4]                                       # (S, 4H)
    eh_proj = proj[:, H4:]                                  # (S, H)

    w_ctx = w_ctx_ref[...]
    v2s = v2s_ref[...]
    b_d = b_d_ref[...]

    # ---- attention + decoder LSTM, fully unrolled ----
    ctx = jnp.zeros((1, H), jnp.float32)
    c = jnp.zeros((1, H), jnp.float32)
    out_rows = []
    for _ in range(S):
        # fused ctx matmul issued first: att_ch part feeds the attention path,
        # W_hh_d part (gate_h) is ready long before it is consumed.
        ctx_proj = jnp.dot(ctx, w_ctx, preferred_element_type=jnp.float32)  # (1,5H)
        gate_h = ctx_proj[:, 0:H4]                          # (1, 4H)
        ch_proj = ctx_proj[:, H4:]                          # (1, H)

        m = jnp.tanh(eh_proj + ch_proj)                     # (S, H)
        # lane-major scores: (1,H) x (S,H)^T -> (1,S); v2s bias dropped
        # (softmax is shift-invariant).
        v = lax.dot_general(v2s, m, (((1,), (1,)), ((), ())),
                            preferred_element_type=jnp.float32)  # (1, S)
        v = v - jnp.max(v, axis=1, keepdims=True)
        ev = jnp.exp(v)                                     # (1, S)
        inv = pl.reciprocal(jnp.sum(ev, axis=1, keepdims=True),
                            approx=True)                    # (1, 1), EUP
        # deferred-normalized contraction straight into gate space
        gate_z = jnp.dot(ev, P, preferred_element_type=jnp.float32) * inv  # (1,4H)

        gates = gate_z + gate_h + b_d
        ctx, c = gate_nonlin(gates, c)
        out_rows.append(ctx)

    out_ref[...] = jnp.concatenate(out_rows, axis=0)        # single dense store


def _reorder_gates(w):
    """Permute PyTorch LSTM gate order [i, f, g, o] -> [i, f, o, g] on axis 0."""
    H = w.shape[0] // 4
    return jnp.concatenate([w[0:2 * H], w[3 * H:4 * H], w[2 * H:3 * H]], axis=0)


def stdatt_lstm_forward(x, p):
    """x: (S, 1, I) float32 -> (S, 1, H) float32."""
    S, _, I = x.shape
    H = p["att_bias"].shape[0]
    x2 = x.reshape(S, I).astype(jnp.float32)

    wih_e = _reorder_gates(p["w_ih_e"]).T                   # (I, 4H)
    whh_e = _reorder_gates(p["w_hh_e"]).T                   # (H, 4H)
    b_e = _reorder_gates(p["b_ih_e"] + p["b_hh_e"]).reshape(1, 4 * H)

    # decoder weights (gate order [i, f, o, g])
    wihd_t = _reorder_gates(p["w_ih_d"]).T                  # (H, 4H)
    whhd_t = _reorder_gates(p["w_hh_d"]).T                  # (H, 4H)
    b_d = _reorder_gates(p["b_ih_d"] + p["b_hh_d"]).reshape(1, 4 * H)

    # merged hoisted e_out projection: [W_ih_d^T | att_eh^T]  (H, 5H)
    w_eout = jnp.concatenate([wihd_t, p["att_eh_w"].T], axis=1)
    eh_bias = (p["att_eh_b"] + p["att_ch_b"] + p["att_bias"]).reshape(1, H)
    b_eout = jnp.concatenate([jnp.zeros((1, 4 * H), jnp.float32), eh_bias],
                             axis=1)                        # (1, 5H)

    # fused ctx-dependent weight: [W_hh_d^T | att_ch^T]  (H, 5H)
    w_ctx = jnp.concatenate([whhd_t, p["att_ch_w"].T], axis=1)

    v2s_row = p["att_v2s_w"].reshape(1, H)                  # (1, H)

    args = (
        x2,
        wih_e, whh_e, b_e,
        w_eout, b_eout,
        v2s_row,
        w_ctx, b_d,
    )

    vmem = pl.BlockSpec(memory_space=pltpu.MemorySpace.VMEM)
    out = pl.pallas_call(
        stdatt_lstm_kernel,
        out_shape=jax.ShapeDtypeStruct((S, H), jnp.float32),
        in_specs=[vmem] * len(args),
        out_specs=vmem,
    )(*args)
    return out.reshape(S, 1, H)


def reference_forward(x, p):
    """Pure-JAX reference mirroring the PyTorch forward (batch == 1)."""
    S, _, I = x.shape
    H = p["att_bias"].shape[0]

    def lstm_step(xt, h, c, wih, whh, bih, bhh):
        g = xt @ wih.T + h @ whh.T + bih + bhh
        i = jax.nn.sigmoid(g[..., 0:H])
        f = jax.nn.sigmoid(g[..., H:2 * H])
        gg = jnp.tanh(g[..., 2 * H:3 * H])
        o = jax.nn.sigmoid(g[..., 3 * H:4 * H])
        c2 = f * c + i * gg
        h2 = o * jnp.tanh(c2)
        return h2, c2

    xs = x.reshape(S, I)
    h = jnp.zeros((1, H), jnp.float32)
    c = jnp.zeros((1, H), jnp.float32)
    e_out = []
    for t in range(S):
        h, c = lstm_step(xs[t:t + 1], h, c,
                         p["w_ih_e"], p["w_hh_e"], p["b_ih_e"], p["b_hh_e"])
        e_out.append(h)
    e_out = jnp.concatenate(e_out, axis=0)                  # (S, H)

    ctx = jnp.zeros((1, H), jnp.float32)
    c = jnp.zeros((1, H), jnp.float32)
    outs = []
    for _ in range(S):
        m = jnp.tanh(e_out @ p["att_eh_w"].T + p["att_eh_b"]
                     + ctx @ p["att_ch_w"].T + p["att_ch_b"]
                     + p["att_bias"])
        v = m @ p["att_v2s_w"].T + p["att_v2s_b"]           # (S, 1)
        s = jax.nn.softmax(v, axis=0)
        z = jnp.sum(e_out * s, axis=0, keepdims=True)       # (1, H)
        ctx, c = lstm_step(z, ctx, c,
                           p["w_ih_d"], p["w_hh_d"], p["b_ih_d"], p["b_hh_d"])
        outs.append(ctx)
    return jnp.stack(outs, axis=0).reshape(S, 1, H)


if __name__ == "__main__":
    S, I, H = 8, 16, 32                                     # seq, input_size, hidden_size
    key = jax.random.PRNGKey(0)
    keys = jax.random.split(key, 16)
    k = 1.0 / float(np.sqrt(H))

    def u(kk, shape):
        return jax.random.uniform(kk, shape, jnp.float32, -k, k)

    params = dict(
        w_ih_e=u(keys[0], (4 * H, I)), w_hh_e=u(keys[1], (4 * H, H)),
        b_ih_e=u(keys[2], (4 * H,)), b_hh_e=u(keys[3], (4 * H,)),
        att_eh_w=u(keys[4], (H, H)), att_eh_b=u(keys[5], (H,)),
        att_ch_w=u(keys[6], (H, H)), att_ch_b=u(keys[7], (H,)),
        att_v2s_w=u(keys[8], (1, H)), att_v2s_b=u(keys[9], (1,)),
        att_bias=jnp.zeros((H,), jnp.float32),              # nn.Parameter(zeros)
        w_ih_d=u(keys[10], (4 * H, H)), w_hh_d=u(keys[11], (4 * H, H)),
        b_ih_d=u(keys[12], (4 * H,)), b_hh_d=u(keys[13], (4 * H,)),
    )

    x = jax.random.normal(keys[15], (S, 1, I), jnp.float32)  # (seq, batch=1, input)

    out = stdatt_lstm_forward(x, params)
    out = jax.block_until_ready(out)

    ref = reference_forward(x, params)
    np.testing.assert_allclose(np.asarray(out), np.asarray(ref),
                               atol=2e-3, rtol=2e-3)
    print("KERNEL_OK")
</pallas_src>

<mosaic_0001>
module attributes {stable_mosaic.version = 11 : i64} {
  func.func @stdatt_lstm_kernel(%arg0: memref<8x16xf32, #tpu.memory_space<vmem>>, %arg1: memref<16x128xf32, #tpu.memory_space<vmem>>, %arg2: memref<32x128xf32, #tpu.memory_space<vmem>>, %arg3: memref<1x128xf32, #tpu.memory_space<vmem>>, %arg4: memref<32x160xf32, #tpu.memory_space<vmem>>, %arg5: memref<1x160xf32, #tpu.memory_space<vmem>>, %arg6: memref<1x32xf32, #tpu.memory_space<vmem>>, %arg7: memref<32x160xf32, #tpu.memory_space<vmem>>, %arg8: memref<1x128xf32, #tpu.memory_space<vmem>>, %arg9: memref<8x32xf32, #tpu.memory_space<vmem>>) attributes {dimension_semantics = [], scalar_prefetch = 0 : i64, scratch_operands = 0 : i64, tpu.core_type = #tpu.core_type<tc>} {
    %c0 = arith.constant 0 : index
    %c0_0 = arith.constant 0 : index
    %0 = vector.load %arg0[%c0, %c0_0] : memref<8x16xf32, #tpu.memory_space<vmem>>, vector<8x16xf32>
    %c0_1 = arith.constant 0 : index
    %c0_2 = arith.constant 0 : index
    %1 = vector.load %arg1[%c0_1, %c0_2] : memref<16x128xf32, #tpu.memory_space<vmem>>, vector<16x128xf32>
    %cst = arith.constant dense<0.000000e+00> : vector<8x128xf32>
    %2 = tpu.matmul %0, %1, %cst {dimension_numbers = #tpu.dot_dimension_numbers<[1], [0], [0], [1], [0, 0, 1, 1], [], []>} : vector<8x16xf32>, vector<16x128xf32>, vector<8x128xf32> -> vector<8x128xf32>
    %c0_3 = arith.constant 0 : index
    %c0_4 = arith.constant 0 : index
    %3 = vector.load %arg3[%c0_3, %c0_4] : memref<1x128xf32, #tpu.memory_space<vmem>>, vector<1x128xf32>
    %4 = vector.broadcast %3 : vector<1x128xf32> to vector<8x128xf32>
    %5 = arith.addf %2, %4 : vector<8x128xf32>
    %c0_5 = arith.constant 0 : index
    %c0_6 = arith.constant 0 : index
    %6 = vector.load %arg2[%c0_5, %c0_6] : memref<32x128xf32, #tpu.memory_space<vmem>>, vector<32x128xf32>
    %cst_7 = arith.constant 0.000000e+00 : f32
    %7 = vector.broadcast %cst_7 : f32 to vector<1x32xf32>
    %cst_8 = arith.constant 0.000000e+00 : f32
    %8 = vector.broadcast %cst_8 : f32 to vector<1x32xf32>
    %9 = vector.extract_strided_slice %5 {offsets = [0, 0], sizes = [1, 128], strides = [1, 1]} : vector<8x128xf32> to vector<1x128xf32>
    %cst_9 = arith.constant dense<0.000000e+00> : vector<1x128xf32>
    %10 = tpu.matmul %7, %6, %cst_9 {dimension_numbers = #tpu.dot_dimension_numbers<[1], [0], [0], [1], [0, 0, 1, 1], [], []>} : vector<1x32xf32>, vector<32x128xf32>, vector<1x128xf32> -> vector<1x128xf32>
    %11 = arith.addf %9, %10 : vector<1x128xf32>
    %12 = vector.extract_strided_slice %11 {offsets = [0, 0], sizes = [1, 96], strides = [1, 1]} : vector<1x128xf32> to vector<1x96xf32>
    %13 = arith.negf %12 : vector<1x96xf32>
    %14 = math.exp %13 : vector<1x96xf32>
    %cst_10 = arith.constant 1.000000e+00 : f32
    %15 = vector.broadcast %cst_10 : f32 to vector<1x96xf32>
    %16 = arith.addf %15, %14 : vector<1x96xf32>
    %17 = arith.divf %15, %16 : vector<1x96xf32>
    %18 = vector.extract_strided_slice %11 {offsets = [0, 96], sizes = [1, 32], strides = [1, 1]} : vector<1x128xf32> to vector<1x32xf32>
    %19 = math.tanh %18 : vector<1x32xf32>
    %20 = vector.extract_strided_slice %17 {offsets = [0, 0], sizes = [1, 32], strides = [1, 1]} : vector<1x96xf32> to vector<1x32xf32>
    %21 = vector.extract_strided_slice %17 {offsets = [0, 32], sizes = [1, 32], strides = [1, 1]} : vector<1x96xf32> to vector<1x32xf32>
    %22 = vector.extract_strided_slice %17 {offsets = [0, 64], sizes = [1, 32], strides = [1, 1]} : vector<1x96xf32> to vector<1x32xf32>
    %23 = arith.mulf %21, %8 : vector<1x32xf32>
    %24 = arith.mulf %20, %19 : vector<1x32xf32>
    %25 = arith.addf %23, %24 : vector<1x32xf32>
    %26 = math.tanh %25 : vector<1x32xf32>
    %27 = arith.mulf %22, %26 : vector<1x32xf32>
    %28 = vector.extract_strided_slice %5 {offsets = [1, 0], sizes = [1, 128], strides = [1, 1]} : vector<8x128xf32> to vector<1x128xf32>
    %cst_11 = arith.constant dense<0.000000e+00> : vector<1x128xf32>
    %29 = tpu.matmul %27, %6, %cst_11 {dimension_numbers = #tpu.dot_dimension_numbers<[1], [0], [0], [1], [0, 0, 1, 1], [], []>} : vector<1x32xf32>, vector<32x128xf32>, vector<1x128xf32> -> vector<1x128xf32>
    %30 = arith.addf %28, %29 : vector<1x128xf32>
    %31 = vector.extract_strided_slice %30 {offsets = [0, 0], sizes = [1, 96], strides = [1, 1]} : vector<1x128xf32> to vector<1x96xf32>
    %32 = arith.negf %31 : vector<1x96xf32>
    %33 = math.exp %32 : vector<1x96xf32>
    %cst_12 = arith.constant 1.000000e+00 : f32
    %34 = vector.broadcast %cst_12 : f32 to vector<1x96xf32>
    %35 = arith.addf %34, %33 : vector<1x96xf32>
    %36 = arith.divf %34, %35 : vector<1x96xf32>
    %37 = vector.extract_strided_slice %30 {offsets = [0, 96], sizes = [1, 32], strides = [1, 1]} : vector<1x128xf32> to vector<1x32xf32>
    %38 = math.tanh %37 : vector<1x32xf32>
    %39 = vector.extract_strided_slice %36 {offsets = [0, 0], sizes = [1, 32], strides = [1, 1]} : vector<1x96xf32> to vector<1x32xf32>
    %40 = vector.extract_strided_slice %36 {offsets = [0, 32], sizes = [1, 32], strides = [1, 1]} : vector<1x96xf32> to vector<1x32xf32>
    %41 = vector.extract_strided_slice %36 {offsets = [0, 64], sizes = [1, 32], strides = [1, 1]} : vector<1x96xf32> to vector<1x32xf32>
    %42 = arith.mulf %40, %25 : vector<1x32xf32>
    %43 = arith.mulf %39, %38 : vector<1x32xf32>
    %44 = arith.addf %42, %43 : vector<1x32xf32>
    %45 = math.tanh %44 : vector<1x32xf32>
    %46 = arith.mulf %41, %45 : vector<1x32xf32>
    %47 = vector.extract_strided_slice %5 {offsets = [2, 0], sizes = [1, 128], strides = [1, 1]} : vector<8x128xf32> to vector<1x128xf32>
    %cst_13 = arith.constant dense<0.000000e+00> : vector<1x128xf32>
    %48 = tpu.matmul %46, %6, %cst_13 {dimension_numbers = #tpu.dot_dimension_numbers<[1], [0], [0], [1], [0, 0, 1, 1], [], []>} : vector<1x32xf32>, vector<32x128xf32>, vector<1x128xf32> -> vector<1x128xf32>
    %49 = arith.addf %47, %48 : vector<1x128xf32>
    %50 = vector.extract_strided_slice %49 {offsets = [0, 0], sizes = [1, 96], strides = [1, 1]} : vector<1x128xf32> to vector<1x96xf32>
    %51 = arith.negf %50 : vector<1x96xf32>
    %52 = math.exp %51 : vector<1x96xf32>
    %cst_14 = arith.constant 1.000000e+00 : f32
    %53 = vector.broadcast %cst_14 : f32 to vector<1x96xf32>
    %54 = arith.addf %53, %52 : vector<1x96xf32>
    %55 = arith.divf %53, %54 : vector<1x96xf32>
    %56 = vector.extract_strided_slice %49 {offsets = [0, 96], sizes = [1, 32], strides = [1, 1]} : vector<1x128xf32> to vector<1x32xf32>
    %57 = math.tanh %56 : vector<1x32xf32>
    %58 = vector.extract_strided_slice %55 {offsets = [0, 0], sizes = [1, 32], strides = [1, 1]} : vector<1x96xf32> to vector<1x32xf32>
    %59 = vector.extract_strided_slice %55 {offsets = [0, 32], sizes = [1, 32], strides = [1, 1]} : vector<1x96xf32> to vector<1x32xf32>
    %60 = vector.extract_strided_slice %55 {offsets = [0, 64], sizes = [1, 32], strides = [1, 1]} : vector<1x96xf32> to vector<1x32xf32>
    %61 = arith.mulf %59, %44 : vector<1x32xf32>
    %62 = arith.mulf %58, %57 : vector<1x32xf32>
    %63 = arith.addf %61, %62 : vector<1x32xf32>
    %64 = math.tanh %63 : vector<1x32xf32>
    %65 = arith.mulf %60, %64 : vector<1x32xf32>
    %66 = vector.extract_strided_slice %5 {offsets = [3, 0], sizes = [1, 128], strides = [1, 1]} : vector<8x128xf32> to vector<1x128xf32>
    %cst_15 = arith.constant dense<0.000000e+00> : vector<1x128xf32>
    %67 = tpu.matmul %65, %6, %cst_15 {dimension_numbers = #tpu.dot_dimension_numbers<[1], [0], [0], [1], [0, 0, 1, 1], [], []>} : vector<1x32xf32>, vector<32x128xf32>, vector<1x128xf32> -> vector<1x128xf32>
    %68 = arith.addf %66, %67 : vector<1x128xf32>
    %69 = vector.extract_strided_slice %68 {offsets = [0, 0], sizes = [1, 96], strides = [1, 1]} : vector<1x128xf32> to vector<1x96xf32>
    %70 = arith.negf %69 : vector<1x96xf32>
    %71 = math.exp %70 : vector<1x96xf32>
    %cst_16 = arith.constant 1.000000e+00 : f32
    %72 = vector.broadcast %cst_16 : f32 to vector<1x96xf32>
    %73 = arith.addf %72, %71 : vector<1x96xf32>
    %74 = arith.divf %72, %73 : vector<1x96xf32>
    %75 = vector.extract_strided_slice %68 {offsets = [0, 96], sizes = [1, 32], strides = [1, 1]} : vector<1x128xf32> to vector<1x32xf32>
    %76 = math.tanh %75 : vector<1x32xf32>
    %77 = vector.extract_strided_slice %74 {offsets = [0, 0], sizes = [1, 32], strides = [1, 1]} : vector<1x96xf32> to vector<1x32xf32>
    %78 = vector.extract_strided_slice %74 {offsets = [0, 32], sizes = [1, 32], strides = [1, 1]} : vector<1x96xf32> to vector<1x32xf32>
    %79 = vector.extract_strided_slice %74 {offsets = [0, 64], sizes = [1, 32], strides = [1, 1]} : vector<1x96xf32> to vector<1x32xf32>
    %80 = arith.mulf %78, %63 : vector<1x32xf32>
    %81 = arith.mulf %77, %76 : vector<1x32xf32>
    %82 = arith.addf %80, %81 : vector<1x32xf32>
    %83 = math.tanh %82 : vector<1x32xf32>
    %84 = arith.mulf %79, %83 : vector<1x32xf32>
    %85 = vector.extract_strided_slice %5 {offsets = [4, 0], sizes = [1, 128], strides = [1, 1]} : vector<8x128xf32> to vector<1x128xf32>
    %cst_17 = arith.constant dense<0.000000e+00> : vector<1x128xf32>
    %86 = tpu.matmul %84, %6, %cst_17 {dimension_numbers = #tpu.dot_dimension_numbers<[1], [0], [0], [1], [0, 0, 1, 1], [], []>} : vector<1x32xf32>, vector<32x128xf32>, vector<1x128xf32> -> vector<1x128xf32>
    %87 = arith.addf %85, %86 : vector<1x128xf32>
    %88 = vector.extract_strided_slice %87 {offsets = [0, 0], sizes = [1, 96], strides = [1, 1]} : vector<1x128xf32> to vector<1x96xf32>
    %89 = arith.negf %88 : vector<1x96xf32>
    %90 = math.exp %89 : vector<1x96xf32>
    %cst_18 = arith.constant 1.000000e+00 : f32
    %91 = vector.broadcast %cst_18 : f32 to vector<1x96xf32>
    %92 = arith.addf %91, %90 : vector<1x96xf32>
    %93 = arith.divf %91, %92 : vector<1x96xf32>
    %94 = vector.extract_strided_slice %87 {offsets = [0, 96], sizes = [1, 32], strides = [1, 1]} : vector<1x128xf32> to vector<1x32xf32>
    %95 = math.tanh %94 : vector<1x32xf32>
    %96 = vector.extract_strided_slice %93 {offsets = [0, 0], sizes = [1, 32], strides = [1, 1]} : vector<1x96xf32> to vector<1x32xf32>
    %97 = vector.extract_strided_slice %93 {offsets = [0, 32], sizes = [1, 32], strides = [1, 1]} : vector<1x96xf32> to vector<1x32xf32>
    %98 = vector.extract_strided_slice %93 {offsets = [0, 64], sizes = [1, 32], strides = [1, 1]} : vector<1x96xf32> to vector<1x32xf32>
    %99 = arith.mulf %97, %82 : vector<1x32xf32>
    %100 = arith.mulf %96, %95 : vector<1x32xf32>
    %101 = arith.addf %99, %100 : vector<1x32xf32>
    %102 = math.tanh %101 : vector<1x32xf32>
    %103 = arith.mulf %98, %102 : vector<1x32xf32>
    %104 = vector.extract_strided_slice %5 {offsets = [5, 0], sizes = [1, 128], strides = [1, 1]} : vector<8x128xf32> to vector<1x128xf32>
    %cst_19 = arith.constant dense<0.000000e+00> : vector<1x128xf32>
    %105 = tpu.matmul %103, %6, %cst_19 {dimension_numbers = #tpu.dot_dimension_numbers<[1], [0], [0], [1], [0, 0, 1, 1], [], []>} : vector<1x32xf32>, vector<32x128xf32>, vector<1x128xf32> -> vector<1x128xf32>
    %106 = arith.addf %104, %105 : vector<1x128xf32>
    %107 = vector.extract_strided_slice %106 {offsets = [0, 0], sizes = [1, 96], strides = [1, 1]} : vector<1x128xf32> to vector<1x96xf32>
    %108 = arith.negf %107 : vector<1x96xf32>
    %109 = math.exp %108 : vector<1x96xf32>
    %cst_20 = arith.constant 1.000000e+00 : f32
    %110 = vector.broadcast %cst_20 : f32 to vector<1x96xf32>
    %111 = arith.addf %110, %109 : vector<1x96xf32>
    %112 = arith.divf %110, %111 : vector<1x96xf32>
    %113 = vector.extract_strided_slice %106 {offsets = [0, 96], sizes = [1, 32], strides = [1, 1]} : vector<1x128xf32> to vector<1x32xf32>
    %114 = math.tanh %113 : vector<1x32xf32>
    %115 = vector.extract_strided_slice %112 {offsets = [0, 0], sizes = [1, 32], strides = [1, 1]} : vector<1x96xf32> to vector<1x32xf32>
    %116 = vector.extract_strided_slice %112 {offsets = [0, 32], sizes = [1, 32], strides = [1, 1]} : vector<1x96xf32> to vector<1x32xf32>
    %117 = vector.extract_strided_slice %112 {offsets = [0, 64], sizes = [1, 32], strides = [1, 1]} : vector<1x96xf32> to vector<1x32xf32>
    %118 = arith.mulf %116, %101 : vector<1x32xf32>
    %119 = arith.mulf %115, %114 : vector<1x32xf32>
    %120 = arith.addf %118, %119 : vector<1x32xf32>
    %121 = math.tanh %120 : vector<1x32xf32>
    %122 = arith.mulf %117, %121 : vector<1x32xf32>
    %123 = vector.extract_strided_slice %5 {offsets = [6, 0], sizes = [1, 128], strides = [1, 1]} : vector<8x128xf32> to vector<1x128xf32>
    %cst_21 = arith.constant dense<0.000000e+00> : vector<1x128xf32>
    %124 = tpu.matmul %122, %6, %cst_21 {dimension_numbers = #tpu.dot_dimension_numbers<[1], [0], [0], [1], [0, 0, 1, 1], [], []>} : vector<1x32xf32>, vector<32x128xf32>, vector<1x128xf32> -> vector<1x128xf32>
    %125 = arith.addf %123, %124 : vector<1x128xf32>
    %126 = vector.extract_strided_slice %125 {offsets = [0, 0], sizes = [1, 96], strides = [1, 1]} : vector<1x128xf32> to vector<1x96xf32>
    %127 = arith.negf %126 : vector<1x96xf32>
    %128 = math.exp %127 : vector<1x96xf32>
    %cst_22 = arith.constant 1.000000e+00 : f32
    %129 = vector.broadcast %cst_22 : f32 to vector<1x96xf32>
    %130 = arith.addf %129, %128 : vector<1x96xf32>
    %131 = arith.divf %129, %130 : vector<1x96xf32>
    %132 = vector.extract_strided_slice %125 {offsets = [0, 96], sizes = [1, 32], strides = [1, 1]} : vector<1x128xf32> to vector<1x32xf32>
    %133 = math.tanh %132 : vector<1x32xf32>
    %134 = vector.extract_strided_slice %131 {offsets = [0, 0], sizes = [1, 32], strides = [1, 1]} : vector<1x96xf32> to vector<1x32xf32>
    %135 = vector.extract_strided_slice %131 {offsets = [0, 32], sizes = [1, 32], strides = [1, 1]} : vector<1x96xf32> to vector<1x32xf32>
    %136 = vector.extract_strided_slice %131 {offsets = [0, 64], sizes = [1, 32], strides = [1, 1]} : vector<1x96xf32> to vector<1x32xf32>
    %137 = arith.mulf %135, %120 : vector<1x32xf32>
    %138 = arith.mulf %134, %133 : vector<1x32xf32>
    %139 = arith.addf %137, %138 : vector<1x32xf32>
    %140 = math.tanh %139 : vector<1x32xf32>
    %141 = arith.mulf %136, %140 : vector<1x32xf32>
    %142 = vector.extract_strided_slice %5 {offsets = [7, 0], sizes = [1, 128], strides = [1, 1]} : vector<8x128xf32> to vector<1x128xf32>
    %cst_23 = arith.constant dense<0.000000e+00> : vector<1x128xf32>
    %143 = tpu.matmul %141, %6, %cst_23 {dimension_numbers = #tpu.dot_dimension_numbers<[1], [0], [0], [1], [0, 0, 1, 1], [], []>} : vector<1x32xf32>, vector<32x128xf32>, vector<1x128xf32> -> vector<1x128xf32>
    %144 = arith.addf %142, %143 : vector<1x128xf32>
    %145 = vector.extract_strided_slice %144 {offsets = [0, 0], sizes = [1, 96], strides = [1, 1]} : vector<1x128xf32> to vector<1x96xf32>
    %146 = arith.negf %145 : vector<1x96xf32>
    %147 = math.exp %146 : vector<1x96xf32>
    %cst_24 = arith.constant 1.000000e+00 : f32
    %148 = vector.broadcast %cst_24 : f32 to vector<1x96xf32>
    %149 = arith.addf %148, %147 : vector<1x96xf32>
    %150 = arith.divf %148, %149 : vector<1x96xf32>
    %151 = vector.extract_strided_slice %144 {offsets = [0, 96], sizes = [1, 32], strides = [1, 1]} : vector<1x128xf32> to vector<1x32xf32>
    %152 = math.tanh %151 : vector<1x32xf32>
    %153 = vector.extract_strided_slice %150 {offsets = [0, 0], sizes = [1, 32], strides = [1, 1]} : vector<1x96xf32> to vector<1x32xf32>
    %154 = vector.extract_strided_slice %150 {offsets = [0, 32], sizes = [1, 32], strides = [1, 1]} : vector<1x96xf32> to vector<1x32xf32>
    %155 = vector.extract_strided_slice %150 {offsets = [0, 64], sizes = [1, 32], strides = [1, 1]} : vector<1x96xf32> to vector<1x32xf32>
    %156 = arith.mulf %154, %139 : vector<1x32xf32>
    %157 = arith.mulf %153, %152 : vector<1x32xf32>
    %158 = arith.addf %156, %157 : vector<1x32xf32>
    %159 = math.tanh %158 : vector<1x32xf32>
    %160 = arith.mulf %155, %159 : vector<1x32xf32>
    %161 = tpu.concatenate %27, %46, %65, %84, %103, %122, %141, %160 in 0 : vector<1x32xf32>, vector<1x32xf32>, vector<1x32xf32>, vector<1x32xf32>, vector<1x32xf32>, vector<1x32xf32>, vector<1x32xf32>, vector<1x32xf32> -> vector<8x32xf32>
    %c0_25 = arith.constant 0 : index
    %c0_26 = arith.constant 0 : index
    %162 = vector.load %arg4[%c0_25, %c0_26] : memref<32x160xf32, #tpu.memory_space<vmem>>, vector<32x160xf32>
    %cst_27 = arith.constant dense<0.000000e+00> : vector<8x160xf32>
    %163 = tpu.matmul %161, %162, %cst_27 {dimension_numbers = #tpu.dot_dimension_numbers<[1], [0], [0], [1], [0, 0, 1, 1], [], []>} : vector<8x32xf32>, vector<32x160xf32>, vector<8x160xf32> -> vector<8x160xf32>
    %c0_28 = arith.constant 0 : index
    %c0_29 = arith.constant 0 : index
    %164 = vector.load %arg5[%c0_28, %c0_29] : memref<1x160xf32, #tpu.memory_space<vmem>>, vector<1x160xf32>
    %165 = vector.broadcast %164 : vector<1x160xf32> to vector<8x160xf32>
    %166 = arith.addf %163, %165 : vector<8x160xf32>
    %167 = vector.extract_strided_slice %166 {offsets = [0, 0], sizes = [8, 128], strides = [1, 1]} : vector<8x160xf32> to vector<8x128xf32>
    %168 = vector.extract_strided_slice %166 {offsets = [0, 128], sizes = [8, 32], strides = [1, 1]} : vector<8x160xf32> to vector<8x32xf32>
    %c0_30 = arith.constant 0 : index
    %c0_31 = arith.constant 0 : index
    %169 = vector.load %arg7[%c0_30, %c0_31] : memref<32x160xf32, #tpu.memory_space<vmem>>, vector<32x160xf32>
    %c0_32 = arith.constant 0 : index
    %c0_33 = arith.constant 0 : index
    %170 = vector.load %arg6[%c0_32, %c0_33] : memref<1x32xf32, #tpu.memory_space<vmem>>, vector<1x32xf32>
    %c0_34 = arith.constant 0 : index
    %c0_35 = arith.constant 0 : index
    %171 = vector.load %arg8[%c0_34, %c0_35] : memref<1x128xf32, #tpu.memory_space<vmem>>, vector<1x128xf32>
    %cst_36 = arith.constant 0.000000e+00 : f32
    %172 = vector.broadcast %cst_36 : f32 to vector<1x32xf32>
    %cst_37 = arith.constant 0.000000e+00 : f32
    %173 = vector.broadcast %cst_37 : f32 to vector<1x32xf32>
    %cst_38 = arith.constant dense<0.000000e+00> : vector<1x160xf32>
    %174 = tpu.matmul %172, %169, %cst_38 {dimension_numbers = #tpu.dot_dimension_numbers<[1], [0], [0], [1], [0, 0, 1, 1], [], []>} : vector<1x32xf32>, vector<32x160xf32>, vector<1x160xf32> -> vector<1x160xf32>
    %175 = vector.extract_strided_slice %174 {offsets = [0, 0], sizes = [1, 128], strides = [1, 1]} : vector<1x160xf32> to vector<1x128xf32>
    %176 = vector.extract_strided_slice %174 {offsets = [0, 128], sizes = [1, 32], strides = [1, 1]} : vector<1x160xf32> to vector<1x32xf32>
    %177 = vector.broadcast %176 : vector<1x32xf32> to vector<8x32xf32>
    %178 = arith.addf %168, %177 : vector<8x32xf32>
    %179 = math.tanh %178 : vector<8x32xf32>
    %cst_39 = arith.constant dense<0.000000e+00> : vector<1x8xf32>
    %180 = tpu.matmul %170, %179, %cst_39 {dimension_numbers = #tpu.dot_dimension_numbers<[1], [1], [0], [0], [0, 0, 1, 0], [], []>} : vector<1x32xf32>, vector<8x32xf32>, vector<1x8xf32> -> vector<1x8xf32>
    %cst_40 = arith.constant dense<0xFF800000> : vector<1xf32>
    %181 = vector.multi_reduction <maximumf>, %180, %cst_40 [1] : vector<1x8xf32> to vector<1xf32>
    %182 = vector.shape_cast %181 : vector<1xf32> to vector<1x1xf32>
    %183 = vector.broadcast %182 : vector<1x1xf32> to vector<1x8xf32>
    %184 = arith.subf %180, %183 : vector<1x8xf32>
    %185 = math.exp %184 : vector<1x8xf32>
    %cst_41 = arith.constant dense<0.000000e+00> : vector<1xf32>
    %186 = vector.multi_reduction <add>, %185, %cst_41 [1] : vector<1x8xf32> to vector<1xf32>
    %187 = vector.shape_cast %186 : vector<1xf32> to vector<1x1xf32>
    %188 = tpu.reciprocal %187 {approx = true} : vector<1x1xf32> -> vector<1x1xf32>
    %cst_42 = arith.constant dense<0.000000e+00> : vector<1x128xf32>
    %189 = tpu.matmul %185, %167, %cst_42 {dimension_numbers = #tpu.dot_dimension_numbers<[1], [0], [0], [1], [0, 0, 1, 1], [], []>} : vector<1x8xf32>, vector<8x128xf32>, vector<1x128xf32> -> vector<1x128xf32>
    %190 = vector.broadcast %188 : vector<1x1xf32> to vector<1x128xf32>
    %191 = arith.mulf %189, %190 : vector<1x128xf32>
    %192 = arith.addf %191, %175 : vector<1x128xf32>
    %193 = arith.addf %192, %171 : vector<1x128xf32>
    %194 = vector.extract_strided_slice %193 {offsets = [0, 0], sizes = [1, 96], strides = [1, 1]} : vector<1x128xf32> to vector<1x96xf32>
    %195 = arith.negf %194 : vector<1x96xf32>
    %196 = math.exp %195 : vector<1x96xf32>
    %cst_43 = arith.constant 1.000000e+00 : f32
    %197 = vector.broadcast %cst_43 : f32 to vector<1x96xf32>
    %198 = arith.addf %197, %196 : vector<1x96xf32>
    %199 = arith.divf %197, %198 : vector<1x96xf32>
    %200 = vector.extract_strided_slice %193 {offsets = [0, 96], sizes = [1, 32], strides = [1, 1]} : vector<1x128xf32> to vector<1x32xf32>
    %201 = math.tanh %200 : vector<1x32xf32>
    %202 = vector.extract_strided_slice %199 {offsets = [0, 0], sizes = [1, 32], strides = [1, 1]} : vector<1x96xf32> to vector<1x32xf32>
    %203 = vector.extract_strided_slice %199 {offsets = [0, 32], sizes = [1, 32], strides = [1, 1]} : vector<1x96xf32> to vector<1x32xf32>
    %204 = vector.extract_strided_slice %199 {offsets = [0, 64], sizes = [1, 32], strides = [1, 1]} : vector<1x96xf32> to vector<1x32xf32>
    %205 = arith.mulf %203, %173 : vector<1x32xf32>
    %206 = arith.mulf %202, %201 : vector<1x32xf32>
    %207 = arith.addf %205, %206 : vector<1x32xf32>
    %208 = math.tanh %207 : vector<1x32xf32>
    %209 = arith.mulf %204, %208 : vector<1x32xf32>
    %cst_44 = arith.constant dense<0.000000e+00> : vector<1x160xf32>
    %210 = tpu.matmul %209, %169, %cst_44 {dimension_numbers = #tpu.dot_dimension_numbers<[1], [0], [0], [1], [0, 0, 1, 1], [], []>} : vector<1x32xf32>, vector<32x160xf32>, vector<1x160xf32> -> vector<1x160xf32>
    %211 = vector.extract_strided_slice %210 {offsets = [0, 0], sizes = [1, 128], strides = [1, 1]} : vector<1x160xf32> to vector<1x128xf32>
    %212 = vector.extract_strided_slice %210 {offsets = [0, 128], sizes = [1, 32], strides = [1, 1]} : vector<1x160xf32> to vector<1x32xf32>
    %213 = vector.broadcast %212 : vector<1x32xf32> to vector<8x32xf32>
    %214 = arith.addf %168, %213 : vector<8x32xf32>
    %215 = math.tanh %214 : vector<8x32xf32>
    %cst_45 = arith.constant dense<0.000000e+00> : vector<1x8xf32>
    %216 = tpu.matmul %170, %215, %cst_45 {dimension_numbers = #tpu.dot_dimension_numbers<[1], [1], [0], [0], [0, 0, 1, 0], [], []>} : vector<1x32xf32>, vector<8x32xf32>, vector<1x8xf32> -> vector<1x8xf32>
    %cst_46 = arith.constant dense<0xFF800000> : vector<1xf32>
    %217 = vector.multi_reduction <maximumf>, %216, %cst_46 [1] : vector<1x8xf32> to vector<1xf32>
    %218 = vector.shape_cast %217 : vector<1xf32> to vector<1x1xf32>
    %219 = vector.broadcast %218 : vector<1x1xf32> to vector<1x8xf32>
    %220 = arith.subf %216, %219 : vector<1x8xf32>
    %221 = math.exp %220 : vector<1x8xf32>
    %cst_47 = arith.constant dense<0.000000e+00> : vector<1xf32>
    %222 = vector.multi_reduction <add>, %221, %cst_47 [1] : vector<1x8xf32> to vector<1xf32>
    %223 = vector.shape_cast %222 : vector<1xf32> to vector<1x1xf32>
    %224 = tpu.reciprocal %223 {approx = true} : vector<1x1xf32> -> vector<1x1xf32>
    %cst_48 = arith.constant dense<0.000000e+00> : vector<1x128xf32>
    %225 = tpu.matmul %221, %167, %cst_48 {dimension_numbers = #tpu.dot_dimension_numbers<[1], [0], [0], [1], [0, 0, 1, 1], [], []>} : vector<1x8xf32>, vector<8x128xf32>, vector<1x128xf32> -> vector<1x128xf32>
    %226 = vector.broadcast %224 : vector<1x1xf32> to vector<1x128xf32>
    %227 = arith.mulf %225, %226 : vector<1x128xf32>
    %228 = arith.addf %227, %211 : vector<1x128xf32>
    %229 = arith.addf %228, %171 : vector<1x128xf32>
    %230 = vector.extract_strided_slice %229 {offsets = [0, 0], sizes = [1, 96], strides = [1, 1]} : vector<1x128xf32> to vector<1x96xf32>
    %231 = arith.negf %230 : vector<1x96xf32>
    %232 = math.exp %231 : vector<1x96xf32>
    %cst_49 = arith.constant 1.000000e+00 : f32
    %233 = vector.broadcast %cst_49 : f32 to vector<1x96xf32>
    %234 = arith.addf %233, %232 : vector<1x96xf32>
    %235 = arith.divf %233, %234 : vector<1x96xf32>
    %236 = vector.extract_strided_slice %229 {offsets = [0, 96], sizes = [1, 32], strides = [1, 1]} : vector<1x128xf32> to vector<1x32xf32>
    %237 = math.tanh %236 : vector<1x32xf32>
    %238 = vector.extract_strided_slice %235 {offsets = [0, 0], sizes = [1, 32], strides = [1, 1]} : vector<1x96xf32> to vector<1x32xf32>
    %239 = vector.extract_strided_slice %235 {offsets = [0, 32], sizes = [1, 32], strides = [1, 1]} : vector<1x96xf32> to vector<1x32xf32>
    %240 = vector.extract_strided_slice %235 {offsets = [0, 64], sizes = [1, 32], strides = [1, 1]} : vector<1x96xf32> to vector<1x32xf32>
    %241 = arith.mulf %239, %207 : vector<1x32xf32>
    %242 = arith.mulf %238, %237 : vector<1x32xf32>
    %243 = arith.addf %241, %242 : vector<1x32xf32>
    %244 = math.tanh %243 : vector<1x32xf32>
    %245 = arith.mulf %240, %244 : vector<1x32xf32>
    %cst_50 = arith.constant dense<0.000000e+00> : vector<1x160xf32>
    %246 = tpu.matmul %245, %169, %cst_50 {dimension_numbers = #tpu.dot_dimension_numbers<[1], [0], [0], [1], [0, 0, 1, 1], [], []>} : vector<1x32xf32>, vector<32x160xf32>, vector<1x160xf32> -> vector<1x160xf32>
    %247 = vector.extract_strided_slice %246 {offsets = [0, 0], sizes = [1, 128], strides = [1, 1]} : vector<1x160xf32> to vector<1x128xf32>
    %248 = vector.extract_strided_slice %246 {offsets = [0, 128], sizes = [1, 32], strides = [1, 1]} : vector<1x160xf32> to vector<1x32xf32>
    %249 = vector.broadcast %248 : vector<1x32xf32> to vector<8x32xf32>
    %250 = arith.addf %168, %249 : vector<8x32xf32>
    %251 = math.tanh %250 : vector<8x32xf32>
    %cst_51 = arith.constant dense<0.000000e+00> : vector<1x8xf32>
    %252 = tpu.matmul %170, %251, %cst_51 {dimension_numbers = #tpu.dot_dimension_numbers<[1], [1], [0], [0], [0, 0, 1, 0], [], []>} : vector<1x32xf32>, vector<8x32xf32>, vector<1x8xf32> -> vector<1x8xf32>
    %cst_52 = arith.constant dense<0xFF800000> : vector<1xf32>
    %253 = vector.multi_reduction <maximumf>, %252, %cst_52 [1] : vector<1x8xf32> to vector<1xf32>
    %254 = vector.shape_cast %253 : vector<1xf32> to vector<1x1xf32>
    %255 = vector.broadcast %254 : vector<1x1xf32> to vector<1x8xf32>
    %256 = arith.subf %252, %255 : vector<1x8xf32>
    %257 = math.exp %256 : vector<1x8xf32>
    %cst_53 = arith.constant dense<0.000000e+00> : vector<1xf32>
    %258 = vector.multi_reduction <add>, %257, %cst_53 [1] : vector<1x8xf32> to vector<1xf32>
    %259 = vector.shape_cast %258 : vector<1xf32> to vector<1x1xf32>
    %260 = tpu.reciprocal %259 {approx = true} : vector<1x1xf32> -> vector<1x1xf32>
    %cst_54 = arith.constant dense<0.000000e+00> : vector<1x128xf32>
    %261 = tpu.matmul %257, %167, %cst_54 {dimension_numbers = #tpu.dot_dimension_numbers<[1], [0], [0], [1], [0, 0, 1, 1], [], []>} : vector<1x8xf32>, vector<8x128xf32>, vector<1x128xf32> -> vector<1x128xf32>
    %262 = vector.broadcast %260 : vector<1x1xf32> to vector<1x128xf32>
    %263 = arith.mulf %261, %262 : vector<1x128xf32>
    %264 = arith.addf %263, %247 : vector<1x128xf32>
    %265 = arith.addf %264, %171 : vector<1x128xf32>
    %266 = vector.extract_strided_slice %265 {offsets = [0, 0], sizes = [1, 96], strides = [1, 1]} : vector<1x128xf32> to vector<1x96xf32>
    %267 = arith.negf %266 : vector<1x96xf32>
    %268 = math.exp %267 : vector<1x96xf32>
    %cst_55 = arith.constant 1.000000e+00 : f32
    %269 = vector.broadcast %cst_55 : f32 to vector<1x96xf32>
    %270 = arith.addf %269, %268 : vector<1x96xf32>
    %271 = arith.divf %269, %270 : vector<1x96xf32>
    %272 = vector.extract_strided_slice %265 {offsets = [0, 96], sizes = [1, 32], strides = [1, 1]} : vector<1x128xf32> to vector<1x32xf32>
    %273 = math.tanh %272 : vector<1x32xf32>
    %274 = vector.extract_strided_slice %271 {offsets = [0, 0], sizes = [1, 32], strides = [1, 1]} : vector<1x96xf32> to vector<1x32xf32>
    %275 = vector.extract_strided_slice %271 {offsets = [0, 32], sizes = [1, 32], strides = [1, 1]} : vector<1x96xf32> to vector<1x32xf32>
    %276 = vector.extract_strided_slice %271 {offsets = [0, 64], sizes = [1, 32], strides = [1, 1]} : vector<1x96xf32> to vector<1x32xf32>
    %277 = arith.mulf %275, %243 : vector<1x32xf32>
    %278 = arith.mulf %274, %273 : vector<1x32xf32>
    %279 = arith.addf %277, %278 : vector<1x32xf32>
    %280 = math.tanh %279 : vector<1x32xf32>
    %281 = arith.mulf %276, %280 : vector<1x32xf32>
    %cst_56 = arith.constant dense<0.000000e+00> : vector<1x160xf32>
    %282 = tpu.matmul %281, %169, %cst_56 {dimension_numbers = #tpu.dot_dimension_numbers<[1], [0], [0], [1], [0, 0, 1, 1], [], []>} : vector<1x32xf32>, vector<32x160xf32>, vector<1x160xf32> -> vector<1x160xf32>
    %283 = vector.extract_strided_slice %282 {offsets = [0, 0], sizes = [1, 128], strides = [1, 1]} : vector<1x160xf32> to vector<1x128xf32>
    %284 = vector.extract_strided_slice %282 {offsets = [0, 128], sizes = [1, 32], strides = [1, 1]} : vector<1x160xf32> to vector<1x32xf32>
    %285 = vector.broadcast %284 : vector<1x32xf32> to vector<8x32xf32>
    %286 = arith.addf %168, %285 : vector<8x32xf32>
    %287 = math.tanh %286 : vector<8x32xf32>
    %cst_57 = arith.constant dense<0.000000e+00> : vector<1x8xf32>
    %288 = tpu.matmul %170, %287, %cst_57 {dimension_numbers = #tpu.dot_dimension_numbers<[1], [1], [0], [0], [0, 0, 1, 0], [], []>} : vector<1x32xf32>, vector<8x32xf32>, vector<1x8xf32> -> vector<1x8xf32>
    %cst_58 = arith.constant dense<0xFF800000> : vector<1xf32>
    %289 = vector.multi_reduction <maximumf>, %288, %cst_58 [1] : vector<1x8xf32> to vector<1xf32>
    %290 = vector.shape_cast %289 : vector<1xf32> to vector<1x1xf32>
    %291 = vector.broadcast %290 : vector<1x1xf32> to vector<1x8xf32>
    %292 = arith.subf %288, %291 : vector<1x8xf32>
    %293 = math.exp %292 : vector<1x8xf32>
    %cst_59 = arith.constant dense<0.000000e+00> : vector<1xf32>
    %294 = vector.multi_reduction <add>, %293, %cst_59 [1] : vector<1x8xf32> to vector<1xf32>
    %295 = vector.shape_cast %294 : vector<1xf32> to vector<1x1xf32>
    %296 = tpu.reciprocal %295 {approx = true} : vector<1x1xf32> -> vector<1x1xf32>
    %cst_60 = arith.constant dense<0.000000e+00> : vector<1x128xf32>
    %297 = tpu.matmul %293, %167, %cst_60 {dimension_numbers = #tpu.dot_dimension_numbers<[1], [0], [0], [1], [0, 0, 1, 1], [], []>} : vector<1x8xf32>, vector<8x128xf32>, vector<1x128xf32> -> vector<1x128xf32>
    %298 = vector.broadcast %296 : vector<1x1xf32> to vector<1x128xf32>
    %299 = arith.mulf %297, %298 : vector<1x128xf32>
    %300 = arith.addf %299, %283 : vector<1x128xf32>
    %301 = arith.addf %300, %171 : vector<1x128xf32>
    %302 = vector.extract_strided_slice %301 {offsets = [0, 0], sizes = [1, 96], strides = [1, 1]} : vector<1x128xf32> to vector<1x96xf32>
    %303 = arith.negf %302 : vector<1x96xf32>
    %304 = math.exp %303 : vector<1x96xf32>
    %cst_61 = arith.constant 1.000000e+00 : f32
    %305 = vector.broadcast %cst_61 : f32 to vector<1x96xf32>
    %306 = arith.addf %305, %304 : vector<1x96xf32>
    %307 = arith.divf %305, %306 : vector<1x96xf32>
    %308 = vector.extract_strided_slice %301 {offsets = [0, 96], sizes = [1, 32], strides = [1, 1]} : vector<1x128xf32> to vector<1x32xf32>
    %309 = math.tanh %308 : vector<1x32xf32>
    %310 = vector.extract_strided_slice %307 {offsets = [0, 0], sizes = [1, 32], strides = [1, 1]} : vector<1x96xf32> to vector<1x32xf32>
    %311 = vector.extract_strided_slice %307 {offsets = [0, 32], sizes = [1, 32], strides = [1, 1]} : vector<1x96xf32> to vector<1x32xf32>
    %312 = vector.extract_strided_slice %307 {offsets = [0, 64], sizes = [1, 32], strides = [1, 1]} : vector<1x96xf32> to vector<1x32xf32>
    %313 = arith.mulf %311, %279 : vector<1x32xf32>
    %314 = arith.mulf %310, %309 : vector<1x32xf32>
    %315 = arith.addf %313, %314 : vector<1x32xf32>
    %316 = math.tanh %315 : vector<1x32xf32>
    %317 = arith.mulf %312, %316 : vector<1x32xf32>
    %cst_62 = arith.constant dense<0.000000e+00> : vector<1x160xf32>
    %318 = tpu.matmul %317, %169, %cst_62 {dimension_numbers = #tpu.dot_dimension_numbers<[1], [0], [0], [1], [0, 0, 1, 1], [], []>} : vector<1x32xf32>, vector<32x160xf32>, vector<1x160xf32> -> vector<1x160xf32>
    %319 = vector.extract_strided_slice %318 {offsets = [0, 0], sizes = [1, 128], strides = [1, 1]} : vector<1x160xf32> to vector<1x128xf32>
    %320 = vector.extract_strided_slice %318 {offsets = [0, 128], sizes = [1, 32], strides = [1, 1]} : vector<1x160xf32> to vector<1x32xf32>
    %321 = vector.broadcast %320 : vector<1x32xf32> to vector<8x32xf32>
    %322 = arith.addf %168, %321 : vector<8x32xf32>
    %323 = math.tanh %322 : vector<8x32xf32>
    %cst_63 = arith.constant dense<0.000000e+00> : vector<1x8xf32>
    %324 = tpu.matmul %170, %323, %cst_63 {dimension_numbers = #tpu.dot_dimension_numbers<[1], [1], [0], [0], [0, 0, 1, 0], [], []>} : vector<1x32xf32>, vector<8x32xf32>, vector<1x8xf32> -> vector<1x8xf32>
    %cst_64 = arith.constant dense<0xFF800000> : vector<1xf32>
    %325 = vector.multi_reduction <maximumf>, %324, %cst_64 [1] : vector<1x8xf32> to vector<1xf32>
    %326 = vector.shape_cast %325 : vector<1xf32> to vector<1x1xf32>
    %327 = vector.broadcast %326 : vector<1x1xf32> to vector<1x8xf32>
    %328 = arith.subf %324, %327 : vector<1x8xf32>
    %329 = math.exp %328 : vector<1x8xf32>
    %cst_65 = arith.constant dense<0.000000e+00> : vector<1xf32>
    %330 = vector.multi_reduction <add>, %329, %cst_65 [1] : vector<1x8xf32> to vector<1xf32>
    %331 = vector.shape_cast %330 : vector<1xf32> to vector<1x1xf32>
    %332 = tpu.reciprocal %331 {approx = true} : vector<1x1xf32> -> vector<1x1xf32>
    %cst_66 = arith.constant dense<0.000000e+00> : vector<1x128xf32>
    %333 = tpu.matmul %329, %167, %cst_66 {dimension_numbers = #tpu.dot_dimension_numbers<[1], [0], [0], [1], [0, 0, 1, 1], [], []>} : vector<1x8xf32>, vector<8x128xf32>, vector<1x128xf32> -> vector<1x128xf32>
    %334 = vector.broadcast %332 : vector<1x1xf32> to vector<1x128xf32>
    %335 = arith.mulf %333, %334 : vector<1x128xf32>
    %336 = arith.addf %335, %319 : vector<1x128xf32>
    %337 = arith.addf %336, %171 : vector<1x128xf32>
    %338 = vector.extract_strided_slice %337 {offsets = [0, 0], sizes = [1, 96], strides = [1, 1]} : vector<1x128xf32> to vector<1x96xf32>
    %339 = arith.negf %338 : vector<1x96xf32>
    %340 = math.exp %339 : vector<1x96xf32>
    %cst_67 = arith.constant 1.000000e+00 : f32
    %341 = vector.broadcast %cst_67 : f32 to vector<1x96xf32>
    %342 = arith.addf %341, %340 : vector<1x96xf32>
    %343 = arith.divf %341, %342 : vector<1x96xf32>
    %344 = vector.extract_strided_slice %337 {offsets = [0, 96], sizes = [1, 32], strides = [1, 1]} : vector<1x128xf32> to vector<1x32xf32>
    %345 = math.tanh %344 : vector<1x32xf32>
    %346 = vector.extract_strided_slice %343 {offsets = [0, 0], sizes = [1, 32], strides = [1, 1]} : vector<1x96xf32> to vector<1x32xf32>
    %347 = vector.extract_strided_slice %343 {offsets = [0, 32], sizes = [1, 32], strides = [1, 1]} : vector<1x96xf32> to vector<1x32xf32>
    %348 = vector.extract_strided_slice %343 {offsets = [0, 64], sizes = [1, 32], strides = [1, 1]} : vector<1x96xf32> to vector<1x32xf32>
    %349 = arith.mulf %347, %315 : vector<1x32xf32>
    %350 = arith.mulf %346, %345 : vector<1x32xf32>
    %351 = arith.addf %349, %350 : vector<1x32xf32>
    %352 = math.tanh %351 : vector<1x32xf32>
    %353 = arith.mulf %348, %352 : vector<1x32xf32>
    %cst_68 = arith.constant dense<0.000000e+00> : vector<1x160xf32>
    %354 = tpu.matmul %353, %169, %cst_68 {dimension_numbers = #tpu.dot_dimension_numbers<[1], [0], [0], [1], [0, 0, 1, 1], [], []>} : vector<1x32xf32>, vector<32x160xf32>, vector<1x160xf32> -> vector<1x160xf32>
    %355 = vector.extract_strided_slice %354 {offsets = [0, 0], sizes = [1, 128], strides = [1, 1]} : vector<1x160xf32> to vector<1x128xf32>
    %356 = vector.extract_strided_slice %354 {offsets = [0, 128], sizes = [1, 32], strides = [1, 1]} : vector<1x160xf32> to vector<1x32xf32>
    %357 = vector.broadcast %356 : vector<1x32xf32> to vector<8x32xf32>
    %358 = arith.addf %168, %357 : vector<8x32xf32>
    %359 = math.tanh %358 : vector<8x32xf32>
    %cst_69 = arith.constant dense<0.000000e+00> : vector<1x8xf32>
    %360 = tpu.matmul %170, %359, %cst_69 {dimension_numbers = #tpu.dot_dimension_numbers<[1], [1], [0], [0], [0, 0, 1, 0], [], []>} : vector<1x32xf32>, vector<8x32xf32>, vector<1x8xf32> -> vector<1x8xf32>
    %cst_70 = arith.constant dense<0xFF800000> : vector<1xf32>
    %361 = vector.multi_reduction <maximumf>, %360, %cst_70 [1] : vector<1x8xf32> to vector<1xf32>
    %362 = vector.shape_cast %361 : vector<1xf32> to vector<1x1xf32>
    %363 = vector.broadcast %362 : vector<1x1xf32> to vector<1x8xf32>
    %364 = arith.subf %360, %363 : vector<1x8xf32>
    %365 = math.exp %364 : vector<1x8xf32>
    %cst_71 = arith.constant dense<0.000000e+00> : vector<1xf32>
    %366 = vector.multi_reduction <add>, %365, %cst_71 [1] : vector<1x8xf32> to vector<1xf32>
    %367 = vector.shape_cast %366 : vector<1xf32> to vector<1x1xf32>
    %368 = tpu.reciprocal %367 {approx = true} : vector<1x1xf32> -> vector<1x1xf32>
    %cst_72 = arith.constant dense<0.000000e+00> : vector<1x128xf32>
    %369 = tpu.matmul %365, %167, %cst_72 {dimension_numbers = #tpu.dot_dimension_numbers<[1], [0], [0], [1], [0, 0, 1, 1], [], []>} : vector<1x8xf32>, vector<8x128xf32>, vector<1x128xf32> -> vector<1x128xf32>
    %370 = vector.broadcast %368 : vector<1x1xf32> to vector<1x128xf32>
    %371 = arith.mulf %369, %370 : vector<1x128xf32>
    %372 = arith.addf %371, %355 : vector<1x128xf32>
    %373 = arith.addf %372, %171 : vector<1x128xf32>
    %374 = vector.extract_strided_slice %373 {offsets = [0, 0], sizes = [1, 96], strides = [1, 1]} : vector<1x128xf32> to vector<1x96xf32>
    %375 = arith.negf %374 : vector<1x96xf32>
    %376 = math.exp %375 : vector<1x96xf32>
    %cst_73 = arith.constant 1.000000e+00 : f32
    %377 = vector.broadcast %cst_73 : f32 to vector<1x96xf32>
    %378 = arith.addf %377, %376 : vector<1x96xf32>
    %379 = arith.divf %377, %378 : vector<1x96xf32>
    %380 = vector.extract_strided_slice %373 {offsets = [0, 96], sizes = [1, 32], strides = [1, 1]} : vector<1x128xf32> to vector<1x32xf32>
    %381 = math.tanh %380 : vector<1x32xf32>
    %382 = vector.extract_strided_slice %379 {offsets = [0, 0], sizes = [1, 32], strides = [1, 1]} : vector<1x96xf32> to vector<1x32xf32>
    %383 = vector.extract_strided_slice %379 {offsets = [0, 32], sizes = [1, 32], strides = [1, 1]} : vector<1x96xf32> to vector<1x32xf32>
    %384 = vector.extract_strided_slice %379 {offsets = [0, 64], sizes = [1, 32], strides = [1, 1]} : vector<1x96xf32> to vector<1x32xf32>
    %385 = arith.mulf %383, %351 : vector<1x32xf32>
    %386 = arith.mulf %382, %381 : vector<1x32xf32>
    %387 = arith.addf %385, %386 : vector<1x32xf32>
    %388 = math.tanh %387 : vector<1x32xf32>
    %389 = arith.mulf %384, %388 : vector<1x32xf32>
    %cst_74 = arith.constant dense<0.000000e+00> : vector<1x160xf32>
    %390 = tpu.matmul %389, %169, %cst_74 {dimension_numbers = #tpu.dot_dimension_numbers<[1], [0], [0], [1], [0, 0, 1, 1], [], []>} : vector<1x32xf32>, vector<32x160xf32>, vector<1x160xf32> -> vector<1x160xf32>
    %391 = vector.extract_strided_slice %390 {offsets = [0, 0], sizes = [1, 128], strides = [1, 1]} : vector<1x160xf32> to vector<1x128xf32>
    %392 = vector.extract_strided_slice %390 {offsets = [0, 128], sizes = [1, 32], strides = [1, 1]} : vector<1x160xf32> to vector<1x32xf32>
    %393 = vector.broadcast %392 : vector<1x32xf32> to vector<8x32xf32>
    %394 = arith.addf %168, %393 : vector<8x32xf32>
    %395 = math.tanh %394 : vector<8x32xf32>
    %cst_75 = arith.constant dense<0.000000e+00> : vector<1x8xf32>
    %396 = tpu.matmul %170, %395, %cst_75 {dimension_numbers = #tpu.dot_dimension_numbers<[1], [1], [0], [0], [0, 0, 1, 0], [], []>} : vector<1x32xf32>, vector<8x32xf32>, vector<1x8xf32> -> vector<1x8xf32>
    %cst_76 = arith.constant dense<0xFF800000> : vector<1xf32>
    %397 = vector.multi_reduction <maximumf>, %396, %cst_76 [1] : vector<1x8xf32> to vector<1xf32>
    %398 = vector.shape_cast %397 : vector<1xf32> to vector<1x1xf32>
    %399 = vector.broadcast %398 : vector<1x1xf32> to vector<1x8xf32>
    %400 = arith.subf %396, %399 : vector<1x8xf32>
    %401 = math.exp %400 : vector<1x8xf32>
    %cst_77 = arith.constant dense<0.000000e+00> : vector<1xf32>
    %402 = vector.multi_reduction <add>, %401, %cst_77 [1] : vector<1x8xf32> to vector<1xf32>
    %403 = vector.shape_cast %402 : vector<1xf32> to vector<1x1xf32>
    %404 = tpu.reciprocal %403 {approx = true} : vector<1x1xf32> -> vector<1x1xf32>
    %cst_78 = arith.constant dense<0.000000e+00> : vector<1x128xf32>
    %405 = tpu.matmul %401, %167, %cst_78 {dimension_numbers = #tpu.dot_dimension_numbers<[1], [0], [0], [1], [0, 0, 1, 1], [], []>} : vector<1x8xf32>, vector<8x128xf32>, vector<1x128xf32> -> vector<1x128xf32>
    %406 = vector.broadcast %404 : vector<1x1xf32> to vector<1x128xf32>
    %407 = arith.mulf %405, %406 : vector<1x128xf32>
    %408 = arith.addf %407, %391 : vector<1x128xf32>
    %409 = arith.addf %408, %171 : vector<1x128xf32>
    %410 = vector.extract_strided_slice %409 {offsets = [0, 0], sizes = [1, 96], strides = [1, 1]} : vector<1x128xf32> to vector<1x96xf32>
    %411 = arith.negf %410 : vector<1x96xf32>
    %412 = math.exp %411 : vector<1x96xf32>
    %cst_79 = arith.constant 1.000000e+00 : f32
    %413 = vector.broadcast %cst_79 : f32 to vector<1x96xf32>
    %414 = arith.addf %413, %412 : vector<1x96xf32>
    %415 = arith.divf %413, %414 : vector<1x96xf32>
    %416 = vector.extract_strided_slice %409 {offsets = [0, 96], sizes = [1, 32], strides = [1, 1]} : vector<1x128xf32> to vector<1x32xf32>
    %417 = math.tanh %416 : vector<1x32xf32>
    %418 = vector.extract_strided_slice %415 {offsets = [0, 0], sizes = [1, 32], strides = [1, 1]} : vector<1x96xf32> to vector<1x32xf32>
    %419 = vector.extract_strided_slice %415 {offsets = [0, 32], sizes = [1, 32], strides = [1, 1]} : vector<1x96xf32> to vector<1x32xf32>
    %420 = vector.extract_strided_slice %415 {offsets = [0, 64], sizes = [1, 32], strides = [1, 1]} : vector<1x96xf32> to vector<1x32xf32>
    %421 = arith.mulf %419, %387 : vector<1x32xf32>
    %422 = arith.mulf %418, %417 : vector<1x32xf32>
    %423 = arith.addf %421, %422 : vector<1x32xf32>
    %424 = math.tanh %423 : vector<1x32xf32>
    %425 = arith.mulf %420, %424 : vector<1x32xf32>
    %cst_80 = arith.constant dense<0.000000e+00> : vector<1x160xf32>
    %426 = tpu.matmul %425, %169, %cst_80 {dimension_numbers = #tpu.dot_dimension_numbers<[1], [0], [0], [1], [0, 0, 1, 1], [], []>} : vector<1x32xf32>, vector<32x160xf32>, vector<1x160xf32> -> vector<1x160xf32>
    %427 = vector.extract_strided_slice %426 {offsets = [0, 0], sizes = [1, 128], strides = [1, 1]} : vector<1x160xf32> to vector<1x128xf32>
    %428 = vector.extract_strided_slice %426 {offsets = [0, 128], sizes = [1, 32], strides = [1, 1]} : vector<1x160xf32> to vector<1x32xf32>
    %429 = vector.broadcast %428 : vector<1x32xf32> to vector<8x32xf32>
    %430 = arith.addf %168, %429 : vector<8x32xf32>
    %431 = math.tanh %430 : vector<8x32xf32>
    %cst_81 = arith.constant dense<0.000000e+00> : vector<1x8xf32>
    %432 = tpu.matmul %170, %431, %cst_81 {dimension_numbers = #tpu.dot_dimension_numbers<[1], [1], [0], [0], [0, 0, 1, 0], [], []>} : vector<1x32xf32>, vector<8x32xf32>, vector<1x8xf32> -> vector<1x8xf32>
    %cst_82 = arith.constant dense<0xFF800000> : vector<1xf32>
    %433 = vector.multi_reduction <maximumf>, %432, %cst_82 [1] : vector<1x8xf32> to vector<1xf32>
    %434 = vector.shape_cast %433 : vector<1xf32> to vector<1x1xf32>
    %435 = vector.broadcast %434 : vector<1x1xf32> to vector<1x8xf32>
    %436 = arith.subf %432, %435 : vector<1x8xf32>
    %437 = math.exp %436 : vector<1x8xf32>
    %cst_83 = arith.constant dense<0.000000e+00> : vector<1xf32>
    %438 = vector.multi_reduction <add>, %437, %cst_83 [1] : vector<1x8xf32> to vector<1xf32>
    %439 = vector.shape_cast %438 : vector<1xf32> to vector<1x1xf32>
    %440 = tpu.reciprocal %439 {approx = true} : vector<1x1xf32> -> vector<1x1xf32>
    %cst_84 = arith.constant dense<0.000000e+00> : vector<1x128xf32>
    %441 = tpu.matmul %437, %167, %cst_84 {dimension_numbers = #tpu.dot_dimension_numbers<[1], [0], [0], [1], [0, 0, 1, 1], [], []>} : vector<1x8xf32>, vector<8x128xf32>, vector<1x128xf32> -> vector<1x128xf32>
    %442 = vector.broadcast %440 : vector<1x1xf32> to vector<1x128xf32>
    %443 = arith.mulf %441, %442 : vector<1x128xf32>
    %444 = arith.addf %443, %427 : vector<1x128xf32>
    %445 = arith.addf %444, %171 : vector<1x128xf32>
    %446 = vector.extract_strided_slice %445 {offsets = [0, 0], sizes = [1, 96], strides = [1, 1]} : vector<1x128xf32> to vector<1x96xf32>
    %447 = arith.negf %446 : vector<1x96xf32>
    %448 = math.exp %447 : vector<1x96xf32>
    %cst_85 = arith.constant 1.000000e+00 : f32
    %449 = vector.broadcast %cst_85 : f32 to vector<1x96xf32>
    %450 = arith.addf %449, %448 : vector<1x96xf32>
    %451 = arith.divf %449, %450 : vector<1x96xf32>
    %452 = vector.extract_strided_slice %445 {offsets = [0, 96], sizes = [1, 32], strides = [1, 1]} : vector<1x128xf32> to vector<1x32xf32>
    %453 = math.tanh %452 : vector<1x32xf32>
    %454 = vector.extract_strided_slice %451 {offsets = [0, 0], sizes = [1, 32], strides = [1, 1]} : vector<1x96xf32> to vector<1x32xf32>
    %455 = vector.extract_strided_slice %451 {offsets = [0, 32], sizes = [1, 32], strides = [1, 1]} : vector<1x96xf32> to vector<1x32xf32>
    %456 = vector.extract_strided_slice %451 {offsets = [0, 64], sizes = [1, 32], strides = [1, 1]} : vector<1x96xf32> to vector<1x32xf32>
    %457 = arith.mulf %455, %423 : vector<1x32xf32>
    %458 = arith.mulf %454, %453 : vector<1x32xf32>
    %459 = arith.addf %457, %458 : vector<1x32xf32>
    %460 = math.tanh %459 : vector<1x32xf32>
    %461 = arith.mulf %456, %460 : vector<1x32xf32>
    %462 = tpu.concatenate %209, %245, %281, %317, %353, %389, %425, %461 in 0 : vector<1x32xf32>, vector<1x32xf32>, vector<1x32xf32>, vector<1x32xf32>, vector<1x32xf32>, vector<1x32xf32>, vector<1x32xf32>, vector<1x32xf32> -> vector<8x32xf32>
    %c0_86 = arith.constant 0 : index
    %c0_87 = arith.constant 0 : index
    %463 = vector.load %arg9[%c0_86, %c0_87] : memref<8x32xf32, #tpu.memory_space<vmem>>, vector<8x32xf32>
    tpu.vector_store %arg9[%c0_86, %c0_87], %462 {strides = array<i32>} : memref<8x32xf32, #tpu.memory_space<vmem>>, vector<8x32xf32>,
    return
  }
}

</mosaic_0001>

<bundles_post_ra>
// kernel: tpu_custom_call.1
= control target key start
LH: loop header
LB: loop body
LE: loop exit
PB: predicated region body
PF: predicated region fallthrough
CT: control target
= control target key end

     0   :  { %14 = vsyncpa [#allocation3], 0  ;;  %s4526_s0 = inlined_call_operand.hbm [shape: f32[8,16], index: 0, kind: input, shape index: {}]   ;;  %s4527_s1 = inlined_call_operand.hbm [shape: f32[16,128], index: 1, kind: input, shape index: {}]   ;;  %s4528_s2 = inlined_call_operand.hbm [shape: f32[32,128], index: 2, kind: input, shape index: {}]   ;;  %s4529_s3 = inlined_call_operand.vmem [shape: f32[1,128], index: 3, kind: input, shape index: {}]   ;;  %s4530_s4 = inlined_call_operand.hbm [shape: f32[32,160], index: 4, kind: input, shape index: {}]   ;;  %s4531_s5 = inlined_call_operand.vmem [shape: f32[1,160], index: 5, kind: input, shape index: {}]   ;;  %s4532_s6 = inlined_call_operand.vmem [shape: f32[1,32], index: 6, kind: input, shape index: {}]   ;;  %s4533_s7 = inlined_call_operand.hbm [shape: f32[32,160], index: 7, kind: input, shape index: {}]   ;;  %s4534_s8 = inlined_call_operand.vmem [shape: f32[1,128], index: 8, kind: input, shape index: {}]   ;;  %s4535_s9 = inlined_call_operand.hbm [shape: f32[8,32], index: 9, kind: output, shape index: {}]  }
   0x1   :  { %15 = vsyncpa [#allocation6], 0 }
   0x2   :  { %16 = vsyncpa [#allocation9], 0 }
   0x3   :  { %17 = vsyncpa [#allocation4], 0  ;;  %s3943_s30 = smov [#allocation5]  }
   0x4   :  { %s33_s10 = sshll.u32 %s3943_s30, 4  ;;  %s34_s10 = int_to_ptr.vmem [resolvable:$true] %s33_s10 }
   0x5   :  { %s3823_s11 = scalar_lea.vmem %s34_s10, 256  ;;  %p3828_p1 = scmp.lt.s32.totalorder %s34_s10, %s34_s10 }
   0x6   :  { %p3824_p0 = scmp.ne.s32.totalorder %s34_s10, %s3823_s11  ;;  %p3829_p2 = scmp.lt.s32.totalorder %s3823_s11, %s3823_s11 }
   0x8   :  { %p3830_p3 = por %p3829_p2, %p3828_p1 }
   0xa   :  { %p3831_p4 = pnand %p3830_p3, %p3824_p0 }
   0xc   :  { %3834 = shalt.err (!%p3831_p4)
}
   0xd   :  { %s3944_s12 = smov 128   ;;  %s3945_s13 = smov 8  }
   0xe   :  { %39 = dma.hbm_to_vmem [thread:$0]  %s4527_s1, 256, %s34_s10, [#allocation6], %s3944_s12, %s3944_s12, %s3945_s13  }
   0xf   :  { %s3946_s16 = smov [#allocation8]  }
  0x10   :  { %s59_s17 = sshll.u32 %s3946_s16, 4  ;;  %s60_s17 = int_to_ptr.vmem [resolvable:$true] %s59_s17 }
  0x11   :  { %s3843_s18 = scalar_lea.vmem %s60_s17, 1024  ;;  %p3848_p6 = scmp.lt.s32.totalorder %s60_s17, %s60_s17 }
  0x12   :  { %p3844_p5 = scmp.ne.s32.totalorder %s60_s17, %s3843_s18  ;;  %p3849_p7 = scmp.lt.s32.totalorder %s3843_s18, %s3843_s18 }
  0x14   :  { %p3850_p8 = por %p3849_p7, %p3848_p6 }
  0x16   :  { %p3851_p9 = pnand %p3850_p8, %p3844_p5 }
  0x18   :  { %3854 = shalt.err (!%p3851_p9)
}
  0x19   :  { %s3947_s19 = smov 256   ;;  %s3948_s20 = smov 16  }
  0x1a   :  { %65 = dma.hbm_to_vmem [thread:$0]  %s4530_s4, 1024, %s60_s17, [#allocation9], %s3947_s19, %s3947_s19, %s3948_s20  }
  0x1b   :  { %s3949_s1 = smov [#allocation2]   ;;  %s3950_s24 = smov [#allocation7]  }
  0x1c   :  { %s24_s23 = sshll.u32 %s3949_s1, 4  ;;  %s45_s25 = sshll.u32 %s3950_s24, 4  ;;  %s25_s23 = int_to_ptr.vmem [resolvable:$true] %s24_s23  ;;  %s46_s25 = int_to_ptr.vmem [resolvable:$true] %s45_s25 }
  0x1d   :  { %s3863_s26 = scalar_lea.vmem %s25_s23, 128  ;;  %p3868_p11 = scmp.lt.s32.totalorder %s25_s23, %s25_s23 }
  0x1e   :  { %p3864_p10 = scmp.ne.s32.totalorder %s25_s23, %s3863_s26  ;;  %p3869_p12 = scmp.lt.s32.totalorder %s3863_s26, %s3863_s26 }
  0x20   :  { %p3870_p13 = por %p3869_p12, %p3868_p11 }
  0x22   :  { %p3871_p0 = pnand %p3870_p13, %p3864_p10 }
  0x24   :  { %3874 = shalt.err (!%p3871_p0)
}
  0x25   :  { %27 = dma.hbm_to_vmem [thread:$0]  %s4526_s0, 128, %s25_s23, [#allocation3]  }
  0x26   :  { %s3883_s29 = scalar_lea.vmem %s46_s25, 512  ;;  %p3888_p2 = scmp.lt.s32.totalorder %s46_s25, %s46_s25 }
  0x27   :  { %p3884_p1 = scmp.ne.s32.totalorder %s46_s25, %s3883_s29  ;;  %p3889_p3 = scmp.lt.s32.totalorder %s3883_s29, %s3883_s29 }
  0x29   :  { %p3890_p4 = por %p3889_p3, %p3888_p2 }
  0x2b   :  { %p3891_p5 = pnand %p3890_p4, %p3884_p1 }
  0x2d   :  { %3894 = shalt.err (!%p3891_p5)
}
  0x2e   :  { %51 = dma.hbm_to_vmem [thread:$0]  %s4528_s2, 512, %s46_s25, [#allocation6], %s3944_s12, %s3944_s12, %s3945_s13  }
  0x2f   :  { %s3951_s10 = smov [#allocation10]  }
  0x30   :  { %s75_s11 = sshll.u32 %s3951_s10, 4  ;;  %s76_s11 = int_to_ptr.vmem [resolvable:$true] %s75_s11 }
  0x31   :  { %s3903_s14 = scalar_lea.vmem %s76_s11, 1024  ;;  %p3908_p7 = scmp.lt.s32.totalorder %s76_s11, %s76_s11 }
  0x32   :  { %p3904_p6 = scmp.ne.s32.totalorder %s76_s11, %s3903_s14  ;;  %p3909_p8 = scmp.lt.s32.totalorder %s3903_s14, %s3903_s14 }
  0x34   :  { %p3910_p9 = por %p3909_p8, %p3908_p7 }
  0x36   :  { %p3911_p10 = pnand %p3910_p9, %p3904_p6 }
  0x38   :  { %3914 = shalt.err (!%p3911_p10)
}
  0x39   :  { %81 = dma.hbm_to_vmem [thread:$0]  %s4533_s7, 1024, %s76_s11, [#allocation9], %s3947_s19, %s3947_s19, %s3948_s20  }
  0x3a   :  { %3935 = dma.done.wait [#allocation3], 128  }
  0x3b   :  { %3936 = vsyncadd [#allocation3], 4294967168 }
  0x3c   :  { %3937 = dma.done.wait [#allocation6], 768  }
  0x3d   :  { %3938 = vsyncadd [#allocation6], 4294966528 }
  0x3e   :  { %3939 = dma.done.wait [#allocation9], 2048  }
  0x3f   :  { %3940 = vsyncadd [#allocation9], 4294965248  ;;  %v3952_v0 = vmov 0.0   ;;  %vm3953_vm0 = vmmov 0   ;;  %v101_v1 = vld [vmem:[#allocation5 + $0x8] sm:$0xff]  ;;  %v100_v3 = vld [vmem:[#allocation5] sm:$0xff] }
  0x40   :  { %3450 = vmatprep.subr.mxu0 %v3952_v0  ;;  %3457 = vmatprep.subr.mxu1 %v3952_v0  ;;  %v4040_v2 = vld [vmem:[#allocation7 + $0x18] sm:$0xff]  ;;  %v4043_v4 = vld [vmem:[#allocation7 + $0x10] sm:$0xff]  ;;  %v99_v5 = vld [vmem:[#allocation2] sm:$0xff]  ;;  %vm109_vm1 = vcmask 130048   ;;  %s3954_s12 = smov 32   ;;  %vm187_vm2 = vcmask 261120  }
  0x41   :  { %3454 = vmatprep.mubr.msk.f32.mxu0 %vm3953_vm0, %v3952_v0  ;;  %3465 = vmatprep.mubr.msk.f32.mxu1 %vm3953_vm0, %v3952_v0  ;;  %v4047_v6 = vld [vmem:[#allocation7 + $0x8] sm:$0xff]  ;;  %v4051_v7 = vld [vmem:[#allocation7] sm:$0xff]  ;;  %vm1034_vm3 = vcmask 1040384   ;;  %vm1036_vm4 = vcmask 1041408   ;;  %vm1038_vm5 = vcmask 1042432   ;;  %vm1040_vm6 = vcmask 1043456  }
  0x42   :  { %3451 = vmatpush3.msra.mxu0 %v101_v1  ;;  %3458 = vmatpush3.msra.mxu1 %v4040_v2  ;;  %v3318_v8 = vld [vmem:[%s4529_s3] ss:$0 sm:$0xff]  ;;  %s3955_s3 = smov 64   ;;  %vm1042_vm7 = vcmask 1044480   ;;  %vm1044_vm8 = vcmask 1045504   ;;  %vm1046_vm9 = vcmask 1046528  }
  0x43   :  { %3452 = vmatprep.subr.mxu0 %v3952_v0  ;;  %3459 = vmatprep.subr.mxu1 %v3952_v0  ;;  %vm1307_vm10 = vcmask 57344   ;;  %vm1318_vm11 = vcmask 64512  }
  0x44   :  { %3453 = vmatpush3.msra.mxu0 %v100_v3  ;;  %3460 = vmatpush3.msra.mxu1 %v4043_v4 }
  0x45   :  { %3455 = vmatmul.mubr.msk.f32.vlgmr.msra.gmra.mxu0 %vm109_vm1, %v99_v5  ;;  %3461 = vmatprep.subr.mxu1 %v3952_v0 }
  0x46   :  { %3462 = vmatpush3.msra.mxu1 %v4047_v6  ;;  %3468 = vmatprep.subr.mxu0 %v3952_v0 }
  0x47   :  { %3463 = vmatprep.subr.mxu1 %v3952_v0  ;;  %3469 = vmatpush3.msra.mxu0 %v4040_v2 }
  0x48   :  { %3464 = vmatpush3.msra.mxu1 %v4051_v7  ;;  %3470 = vmatprep.subr.mxu0 %v3952_v0 }
  0x49   :  { %3466 = vmatmul.mubr.f32.vlgmr.msra.gmra.mxu1 %v3952_v0  ;;  %3471 = vmatpush3.msra.mxu0 %v4043_v4 }
  0x4a   :  { %3472 = vmatprep.subr.mxu0 %v3952_v0  ;;  %3476 = vmatprep.mubr.msk.f32.mxu0 %vm3953_vm0, %v3952_v0 }
  0x4b   :  { %3473 = vmatpush3.msra.mxu0 %v4047_v6  ;;  %3479 = vmatprep.subr.mxu1 %v3952_v0 }
  0x4c   :  { %3474 = vmatprep.subr.mxu0 %v3952_v0  ;;  %3480 = vmatpush3.msra.mxu1 %v4040_v2 }
  0x4d   :  { %3475 = vmatpush3.msra.mxu0 %v4051_v7  ;;  %3481 = vmatprep.subr.mxu1 %v3952_v0 }
  0x4e   :  { %3482 = vmatpush3.msra.mxu1 %v4043_v4  ;;  %3487 = vmatprep.mubr.msk.f32.mxu1 %vm3953_vm0, %v3952_v0 }
  0x4f   :  { %3483 = vmatprep.subr.mxu1 %v3952_v0  ;;  %3490 = vmatprep.subr.mxu0 %v3952_v0 }
  0x50   :  { %3484 = vmatpush3.msra.mxu1 %v4047_v6 }
  0x51   :  { %3485 = vmatprep.subr.mxu1 %v3952_v0 }
  0x52   :  { %3486 = vmatpush3.msra.mxu1 %v4051_v7 }
  0x53   :  { %3501 = vmatprep.subr.mxu1 %v3952_v0 }
 0x105   :  { %v179_v9 = vpop.f32.mrf.mxu0 }
 0x106   :  { %v4082_v10 = vadd.f32 %v3318_v8, %v179_v9 }
 0x107   :  { %v3456_v11 = vpop.f32.mrf.mxu0 }
 0x109   :  { %v257_v12 = vpop.f32.mrf.mxu1 }
 0x10a   :  { %v261_v13 = vadd.f32 %v257_v12, %v4082_v10 }
 0x10b   :  { %v3467_v14 = vpop.f32.mrf.mxu1 }
 0x10c   :  { %3639 = vtanh.f32 %v261_v13  ;;  %v3320_v16 = vmul.f32 -1.442695, %v261_v13 }
 0x10e   :  { %3641 = vpow2.f32 %v3320_v16 }
 0x119   :  { %v3640_v15 = vpop.eup %3639 }
 0x11a   :  { %271 = vrot.lane.b32.xlu0 %v3640_v15, %s3954_s12 }
 0x11b   :  { %v3642_v17 = vpop.eup %3641 }
 0x11c   :  { %v265_v18 = vadd.f32 1.0, %v3642_v17 }
 0x11e   :  { %3643 = vrcp.f32 %v265_v18 }
 0x12b   :  { %v3644_v19 = vpop.eup %3643 }
 0x12c   :  { %v269_v22 = vmul.f32 0.0, %v3644_v19 }
 0x18c   :  { %v272_v20 = vpop.permute.xlu0 %271 }
 0x18d   :  { %v274_v21 = vmul.f32 %v3644_v19, %v272_v20 }
 0x18f   :  { %276 = vrot.lane.b32.xlu0 %v274_v21, %s3954_s12 }
 0x201   :  { %v277_v23 = vpop.permute.xlu0 %276 }
 0x202   :  { %v279_v24 = vadd.f32 %v277_v23, %v269_v22 }
 0x204   :  { %3645 = vtanh.f32 %v279_v24  ;;  %v373_v40 = vrot.slane %v279_v24, 7 }
 0x211   :  { %v3646_v25 = vpop.eup %3645 }
 0x212   :  { %282 = vrot.lane.b32.xlu1 %v3646_v25, %s3954_s12 }
 0x284   :  { %v283_v26 = vpop.permute.xlu1 %282 }
 0x285   :  { %v4088_v27 = vmul.f32 %v3644_v19, %v283_v26 }
 0x287   :  { %287 = vrot.lane.b32.xlu1 %v4088_v27, %s3955_s3 }
 0x2f9   :  { %v288_v28 = vpop.permute.xlu1 %287 }
 0x2fa   :  { %3477 = vmatmul.mubr.msk.f32.vlgmr.msra.gmra.mxu0 %vm187_vm2, %v288_v28 }
 0x2fb   :  { %3491 = vmatpush3.msra.mxu0 %v4040_v2  ;;  %3498 = vmatprep.mubr.msk.f32.mxu0 %vm3953_vm0, %v3952_v0 }
 0x2fc   :  { %3492 = vmatprep.subr.mxu0 %v3952_v0 }
 0x2fd   :  { %3493 = vmatpush3.msra.mxu0 %v4043_v4 }
 0x2fe   :  { %3494 = vmatprep.subr.mxu0 %v3952_v0 }
 0x2ff   :  { %3495 = vmatpush3.msra.mxu0 %v4047_v6 }
 0x300   :  { %3496 = vmatprep.subr.mxu0 %v3952_v0 }
 0x301   :  { %3497 = vmatpush3.msra.mxu0 %v4051_v7 }
 0x302   :  { %3512 = vmatprep.subr.mxu0 %v3952_v0 }
 0x3ba   :  { %v357_v29 = vpop.f32.mrf.mxu0 }
 0x3bb   :  { %v362_v30 = vrot.slane %v357_v29, 7 }
 0x3bc   :  { %v3478_v31 = vpop.f32.mrf.mxu0 }
 0x3bd   :  { %v364_v32 = vadd.f32 %v362_v30, %v4082_v10 }
 0x3bf   :  { %3647 = vtanh.f32 %v364_v32  ;;  %v3322_v34 = vmul.f32 -1.442695, %v364_v32 }
 0x3c1   :  { %3649 = vpow2.f32 %v3322_v34 }
 0x3cc   :  { %v3648_v33 = vpop.eup %3647 }
 0x3cd   :  { %377 = vrot.lane.b32.xlu0 %v3648_v33, %s3954_s12 }
 0x3ce   :  { %v3650_v35 = vpop.eup %3649 }
 0x3cf   :  { %v368_v36 = vadd.f32 1.0, %v3650_v35 }
 0x3d1   :  { %3651 = vrcp.f32 %v368_v36 }
 0x3de   :  { %v3652_v37 = vpop.eup %3651 }
 0x3df   :  { %v375_v41 = vmul.f32 %v3652_v37, %v373_v40 }
 0x43f   :  { %v378_v38 = vpop.permute.xlu0 %377 }
 0x440   :  { %v380_v39 = vmul.f32 %v3652_v37, %v378_v38 }
 0x442   :  { %382 = vrot.lane.b32.xlu1 %v380_v39, %s3954_s12 }
 0x4b4   :  { %v383_v42 = vpop.permute.xlu1 %382 }
 0x4b5   :  { %v385_v43 = vadd.f32 %v383_v42, %v375_v41 }
 0x4b7   :  { %3653 = vtanh.f32 %v385_v43  ;;  %v480_v60 = vrot.slane %v385_v43, 7 }
 0x4c4   :  { %v3654_v44 = vpop.eup %3653 }
 0x4c5   :  { %388 = vrot.lane.b32.xlu0 %v3654_v44, %s3954_s12 }
 0x537   :  { %v389_v45 = vpop.permute.xlu0 %388 }
 0x538   :  { %v391_v46 = vmul.f32 %v3652_v37, %v389_v45 }
 0x53a   :  { %v393_v47 = vrot.slane %v391_v46, 1  ;;  %v1035_v8 = vsel %vm1034_vm3, %v4088_v27, %v391_v46 }
 0x53c   :  { %394 = vrot.lane.b32.xlu1 %v393_v47, %s3955_s3 }
 0x5ae   :  { %v395_v48 = vpop.permute.xlu1 %394 }
 0x5af   :  { %3488 = vmatmul.mubr.msk.f32.vlgmr.msra.gmra.mxu1 %vm187_vm2, %v395_v48 }
 0x5b0   :  { %3502 = vmatpush3.msra.mxu1 %v4040_v2  ;;  %3509 = vmatprep.mubr.msk.f32.mxu1 %vm3953_vm0, %v3952_v0 }
 0x5b1   :  { %3503 = vmatprep.subr.mxu1 %v3952_v0 }
 0x5b2   :  { %3504 = vmatpush3.msra.mxu1 %v4043_v4 }
 0x5b3   :  { %3505 = vmatprep.subr.mxu1 %v3952_v0 }
 0x5b4   :  { %3506 = vmatpush3.msra.mxu1 %v4047_v6 }
 0x5b5   :  { %3507 = vmatprep.subr.mxu1 %v3952_v0 }
 0x5b6   :  { %3508 = vmatpush3.msra.mxu1 %v4051_v7 }
 0x5b7   :  { %3523 = vmatprep.subr.mxu1 %v3952_v0 }
 0x66f   :  { %v464_v49 = vpop.f32.mrf.mxu1 }
 0x670   :  { %v469_v50 = vrot.slane %v464_v49, 6 }
 0x671   :  { %v3489_v51 = vpop.f32.mrf.mxu1 }
 0x672   :  { %v471_v52 = vadd.f32 %v469_v50, %v4082_v10 }
 0x674   :  { %3655 = vtanh.f32 %v471_v52  ;;  %v3324_v54 = vmul.f32 -1.442695, %v471_v52 }
 0x676   :  { %3657 = vpow2.f32 %v3324_v54 }
 0x681   :  { %v3656_v53 = vpop.eup %3655 }
 0x682   :  { %484 = vrot.lane.b32.xlu0 %v3656_v53, %s3954_s12 }
 0x683   :  { %v3658_v55 = vpop.eup %3657 }
 0x684   :  { %v475_v56 = vadd.f32 1.0, %v3658_v55 }
 0x686   :  { %3659 = vrcp.f32 %v475_v56 }
 0x693   :  { %v3660_v57 = vpop.eup %3659 }
 0x694   :  { %v482_v61 = vmul.f32 %v3660_v57, %v480_v60 }
 0x6f4   :  { %v485_v58 = vpop.permute.xlu0 %484 }
 0x6f5   :  { %v487_v59 = vmul.f32 %v3660_v57, %v485_v58 }
 0x6f7   :  { %489 = vrot.lane.b32.xlu1 %v487_v59, %s3954_s12 }
 0x769   :  { %v490_v62 = vpop.permute.xlu1 %489 }
 0x76a   :  { %v492_v63 = vadd.f32 %v490_v62, %v482_v61 }
 0x76c   :  { %3661 = vtanh.f32 %v492_v63  ;;  %v587_v24 = vrot.slane %v492_v63, 7 }
 0x779   :  { %v3662_v1 = vpop.eup %3661 }
 0x77a   :  { %495 = vrot.lane.b32.xlu0 %v3662_v1, %s3954_s12 }
 0x7ec   :  { %v496_v3 = vpop.permute.xlu0 %495 }
 0x7ed   :  { %v498_v5 = vmul.f32 %v3660_v57, %v496_v3 }
 0x7ef   :  { %v500_v9 = vrot.slane %v498_v5, 2  ;;  %v1037_v11 = vsel %vm1036_vm4, %v1035_v8, %v498_v5 }
 0x7f1   :  { %501 = vrot.lane.b32.xlu1 %v500_v9, %s3955_s3 }
 0x863   :  { %v502_v12 = vpop.permute.xlu1 %501 }
 0x864   :  { %3499 = vmatmul.mubr.msk.f32.vlgmr.msra.gmra.mxu0 %vm187_vm2, %v502_v12 }
 0x865   :  { %3513 = vmatpush3.msra.mxu0 %v4040_v2  ;;  %3520 = vmatprep.mubr.msk.f32.mxu0 %vm3953_vm0, %v3952_v0 }
 0x866   :  { %3514 = vmatprep.subr.mxu0 %v3952_v0 }
 0x867   :  { %3515 = vmatpush3.msra.mxu0 %v4043_v4 }
 0x868   :  { %3516 = vmatprep.subr.mxu0 %v3952_v0 }
 0x869   :  { %3517 = vmatpush3.msra.mxu0 %v4047_v6 }
 0x86a   :  { %3518 = vmatprep.subr.mxu0 %v3952_v0 }
 0x86b   :  { %3519 = vmatpush3.msra.mxu0 %v4051_v7 }
 0x86c   :  { %3534 = vmatprep.subr.mxu0 %v3952_v0 }
 0x924   :  { %v571_v13 = vpop.f32.mrf.mxu0 }
 0x925   :  { %v576_v14 = vrot.slane %v571_v13, 5 }
 0x926   :  { %v3500_v15 = vpop.f32.mrf.mxu0 }
 0x927   :  { %v578_v16 = vadd.f32 %v576_v14, %v4082_v10 }
 0x929   :  { %3663 = vtanh.f32 %v578_v16  ;;  %v3326_v18 = vmul.f32 -1.442695, %v578_v16 }
 0x92b   :  { %3665 = vpow2.f32 %v3326_v18 }
 0x936   :  { %v3664_v17 = vpop.eup %3663 }
 0x937   :  { %591 = vrot.lane.b32.xlu0 %v3664_v17, %s3954_s12 }
 0x938   :  { %v3666_v19 = vpop.eup %3665 }
 0x939   :  { %v582_v20 = vadd.f32 1.0, %v3666_v19 }
 0x93b   :  { %3667 = vrcp.f32 %v582_v20 }
 0x948   :  { %v3668_v21 = vpop.eup %3667 }
 0x949   :  { %v589_v25 = vmul.f32 %v3668_v21, %v587_v24 }
 0x9a9   :  { %v592_v22 = vpop.permute.xlu0 %591 }
 0x9aa   :  { %v594_v23 = vmul.f32 %v3668_v21, %v592_v22 }
 0x9ac   :  { %596 = vrot.lane.b32.xlu1 %v594_v23, %s3954_s12 }
 0xa1e   :  { %v597_v26 = vpop.permute.xlu1 %596 }
 0xa1f   :  { %v599_v27 = vadd.f32 %v597_v26, %v589_v25 }
 0xa21   :  { %3669 = vtanh.f32 %v599_v27  ;;  %v694_v45 = vrot.slane %v599_v27, 7 }
 0xa2e   :  { %v3670_v28 = vpop.eup %3669 }
 0xa2f   :  { %602 = vrot.lane.b32.xlu0 %v3670_v28, %s3954_s12 }
 0xaa1   :  { %v603_v29 = vpop.permute.xlu0 %602 }
 0xaa2   :  { %v605_v30 = vmul.f32 %v3668_v21, %v603_v29 }
 0xaa4   :  { %v607_v31 = vrot.slane %v605_v30, 3  ;;  %v1039_v32 = vsel %vm1038_vm5, %v1037_v11, %v605_v30 }
 0xaa6   :  { %608 = vrot.lane.b32.xlu1 %v607_v31, %s3955_s3 }
 0xb18   :  { %v609_v33 = vpop.permute.xlu1 %608 }
 0xb19   :  { %3510 = vmatmul.mubr.msk.f32.vlgmr.msra.gmra.mxu1 %vm187_vm2, %v609_v33 }
 0xb1a   :  { %3524 = vmatpush3.msra.mxu1 %v4040_v2  ;;  %3531 = vmatprep.mubr.msk.f32.mxu1 %vm3953_vm0, %v3952_v0 }
 0xb1b   :  { %3525 = vmatprep.subr.mxu1 %v3952_v0 }
 0xb1c   :  { %3526 = vmatpush3.msra.mxu1 %v4043_v4 }
 0xb1d   :  { %3527 = vmatprep.subr.mxu1 %v3952_v0 }
 0xb1e   :  { %3528 = vmatpush3.msra.mxu1 %v4047_v6 }
 0xb1f   :  { %3529 = vmatprep.subr.mxu1 %v3952_v0 }
 0xb20   :  { %3530 = vmatpush3.msra.mxu1 %v4051_v7 }
 0xbd9   :  { %v678_v34 = vpop.f32.mrf.mxu1 }
 0xbda   :  { %v683_v35 = vrot.slane %v678_v34, 4 }
 0xbdb   :  { %v3511_v36 = vpop.f32.mrf.mxu1 }
 0xbdc   :  { %v685_v37 = vadd.f32 %v683_v35, %v4082_v10 }
 0xbde   :  { %3671 = vtanh.f32 %v685_v37  ;;  %v3328_v39 = vmul.f32 -1.442695, %v685_v37 }
 0xbe0   :  { %3673 = vpow2.f32 %v3328_v39 }
 0xbeb   :  { %v3672_v38 = vpop.eup %3671 }
 0xbec   :  { %698 = vrot.lane.b32.xlu0 %v3672_v38, %s3954_s12 }
 0xbed   :  { %v3674_v40 = vpop.eup %3673 }
 0xbee   :  { %v689_v41 = vadd.f32 1.0, %v3674_v40 }
 0xbf0   :  { %3675 = vrcp.f32 %v689_v41 }
 0xbfd   :  { %v3676_v42 = vpop.eup %3675 }
 0xbfe   :  { %v696_v46 = vmul.f32 %v3676_v42, %v694_v45 }
 0xc5e   :  { %v699_v43 = vpop.permute.xlu0 %698 }
 0xc5f   :  { %v701_v44 = vmul.f32 %v3676_v42, %v699_v43 }
 0xc61   :  { %703 = vrot.lane.b32.xlu1 %v701_v44, %s3954_s12 }
 0xcd3   :  { %v704_v47 = vpop.permute.xlu1 %703 }
 0xcd4   :  { %v706_v48 = vadd.f32 %v704_v47, %v696_v46 }
 0xcd6   :  { %3677 = vtanh.f32 %v706_v48 }
 0xce3   :  { %v3678_v49 = vpop.eup %3677 }
 0xce4   :  { %709 = vrot.lane.b32.xlu0 %v3678_v49, %s3954_s12 }
 0xd56   :  { %v710_v50 = vpop.permute.xlu0 %709 }
 0xd57   :  { %v712_v51 = vmul.f32 %v3676_v42, %v710_v50  ;;  %v4193_v50 = vld [vmem:[#allocation10 + $0x30] sm:$0xff] }
 0xd59   :  { %v714_v52 = vrot.slane %v712_v51, 4  ;;  %v1041_v53 = vsel %vm1040_vm6, %v1039_v32, %v712_v51  ;;  %v1055_v51 = vld [vmem:[#allocation8 + $0x38] sm:$0xff] }
 0xd5a   :  { %1097 = vmatprep.subr.mxu1 %v1055_v51 }
 0xd5b   :  { %715 = vrot.lane.b32.xlu1 %v714_v52, %s3955_s3  ;;  %v4196_v52 = vld [vmem:[#allocation10 + $0x28] sm:$0xff] }
 0xdcd   :  { %v716_v54 = vpop.permute.xlu1 %715 }
 0xdce   :  { %3521 = vmatmul.mubr.msk.f32.vlgmr.msra.gmra.mxu0 %vm187_vm2, %v716_v54  ;;  %v4198_v54 = vld [vmem:[#allocation10 + $0x20] sm:$0xff] }
 0xdcf   :  { %3535 = vmatpush3.msra.mxu0 %v4040_v2  ;;  %3542 = vmatprep.mubr.msk.f32.mxu0 %vm3953_vm0, %v3952_v0 }
 0xdd0   :  { %3536 = vmatprep.subr.mxu0 %v3952_v0 }
 0xdd1   :  { %3537 = vmatpush3.msra.mxu0 %v4043_v4 }
 0xdd2   :  { %3538 = vmatprep.subr.mxu0 %v3952_v0 }
 0xdd3   :  { %3539 = vmatpush3.msra.mxu0 %v4047_v6 }
 0xdd4   :  { %3540 = vmatprep.subr.mxu0 %v3952_v0 }
 0xdd5   :  { %3541 = vmatpush3.msra.mxu0 %v4051_v7  ;;  %v801_v7 = vrot.slane %v706_v48, 7 }
 0xe8e   :  { %v785_v55 = vpop.f32.mrf.mxu0 }
 0xe8f   :  { %v790_v56 = vrot.slane %v785_v55, 3  ;;  %v1053_v55 = vld [vmem:[#allocation8 + $0x28] sm:$0xff] }
 0xe90   :  { %v3522_v57 = vpop.f32.mrf.mxu0 }
 0xe91   :  { %v792_v2 = vadd.f32 %v790_v56, %v4082_v10  ;;  %v4201_v56 = vld [vmem:[#allocation10 + $0x18] sm:$0xff]  ;;  %v1052_v57 = vld [vmem:[#allocation8 + $0x20] sm:$0xff] }
 0xe93   :  { %3679 = vtanh.f32 %v792_v2  ;;  %v3330_v59 = vmul.f32 -1.442695, %v792_v2  ;;  %v4204_v2 = vld [vmem:[#allocation10 + $0x10] sm:$0xff] }
 0xe95   :  { %3681 = vpow2.f32 %v3330_v59  ;;  %v4207_v59 = vld [vmem:[#allocation10 + $0x8] sm:$0xff] }
 0xea0   :  { %v3680_v58 = vpop.eup %3679 }
 0xea1   :  { %805 = vrot.lane.b32.xlu0 %v3680_v58, %s3954_s12  ;;  %v1051_v58 = vld [vmem:[#allocation8 + $0x18] sm:$0xff] }
 0xea2   :  { %v3682_v4 = vpop.eup %3681 }
 0xea3   :  { %v796_v60 = vadd.f32 1.0, %v3682_v4  ;;  %v1050_v4 = vld [vmem:[#allocation8 + $0x10] sm:$0xff] }
 0xea5   :  { %3683 = vrcp.f32 %v796_v60  ;;  %v1049_v60 = vld [vmem:[#allocation8 + $0x8] sm:$0xff] }
 0xeb2   :  { %v3684_v61 = vpop.eup %3683 }
 0xeb3   :  { %v803_v63 = vmul.f32 %v3684_v61, %v801_v7 }
 0xf13   :  { %v806_v6 = vpop.permute.xlu0 %805 }
 0xf14   :  { %v808_v62 = vmul.f32 %v3684_v61, %v806_v6  ;;  %v1048_v6 = vld [vmem:[#allocation8] sm:$0xff] }
 0xf16   :  { %810 = vrot.lane.b32.xlu1 %v808_v62, %s3954_s12 }
 0xf88   :  { %v811_v1 = vpop.permute.xlu1 %810 }
 0xf89   :  { %v813_v3 = vadd.f32 %v811_v1, %v803_v63 }
 0xf8b   :  { %3685 = vtanh.f32 %v813_v3  ;;  %v908_v25 = vrot.slane %v813_v3, 7 }
 0xf98   :  { %v3686_v5 = vpop.eup %3685 }
 0xf99   :  { %816 = vrot.lane.b32.xlu0 %v3686_v5, %s3954_s12  ;;  %v1058_v5 = vlaneseq }
0x100b   :  { %v817_v8 = vpop.permute.xlu0 %816 }
0x100c   :  { %v819_v9 = vmul.f32 %v3684_v61, %v817_v8  ;;  %v4210_v61 = vld [vmem:[#allocation10] sm:$0xff]  ;;  %v1059_v8 = vshrl.u32 %v1058_v5, 7 }
0x100e   :  { %v821_v11 = vrot.slane %v819_v9, 5  ;;  %v1043_v12 = vsel %vm1042_vm7, %v1041_v53, %v819_v9  ;;  %v1054_v53 = vld [vmem:[#allocation8 + $0x30] sm:$0xff]  ;;  %v4227_v9 = vsub.s32 0, %v1059_v8 }
0x1010   :  { %822 = vrot.lane.b32.xlu1 %v821_v11, %s3955_s3  ;;  %v1056_v11 = vld [vmem:[%s4531_s5] sm:$0x3] }
0x1082   :  { %v823_v13 = vpop.permute.xlu1 %822 }
0x1083   :  { %3532 = vmatmul.mubr.msk.f32.vlgmr.msra.gmra.mxu1 %vm187_vm2, %v823_v13 }
0x1084   :  { %1137 = vmatprep.mubr.f32.mxu1 %v3952_v0  ;;  %1098 = vmatpush1.msra.mxu1 %v1054_v53 }
0x1085   :  { %1099 = vmatprep.subr.mxu1 %v1053_v55 }
0x1086   :  { %1100 = vmatpush1.msra.mxu1 %v1052_v57 }
0x1087   :  { %1101 = vmatprep.subr.mxu1 %v1051_v58 }
0x1088   :  { %1102 = vmatpush1.msra.mxu1 %v1050_v4 }
0x1089   :  { %1103 = vmatprep.subr.mxu1 %v1049_v60 }
0x108a   :  { %1104 = vmatpush1.msra.mxu1 %v1048_v6 }
0x108b   :  { %3545 = vmatprep.subr.mxu1 %v3952_v0 }
0x1143   :  { %v892_v14 = vpop.f32.mrf.mxu1 }
0x1144   :  { %v897_v15 = vrot.slane %v892_v14, 2  ;;  %v1061_v14 = vrot.slane %v1056_v11, %v4227_v9 }
0x1145   :  { %v3533_v16 = vpop.f32.mrf.mxu1 }
0x1146   :  { %v899_v17 = vadd.f32 %v897_v15, %v4082_v10 }
0x1148   :  { %3687 = vtanh.f32 %v899_v17  ;;  %v3332_v19 = vmul.f32 -1.442695, %v899_v17 }
0x114a   :  { %3689 = vpow2.f32 %v3332_v19 }
0x1155   :  { %v3688_v18 = vpop.eup %3687 }
0x1156   :  { %912 = vrot.lane.b32.xlu0 %v3688_v18, %s3954_s12 }
0x1157   :  { %v3690_v20 = vpop.eup %3689 }
0x1158   :  { %v903_v21 = vadd.f32 1.0, %v3690_v20 }
0x115a   :  { %3691 = vrcp.f32 %v903_v21 }
0x1167   :  { %v3692_v22 = vpop.eup %3691 }
0x1168   :  { %v910_v26 = vmul.f32 %v3692_v22, %v908_v25 }
0x11c8   :  { %v913_v23 = vpop.permute.xlu0 %912 }
0x11c9   :  { %v915_v24 = vmul.f32 %v3692_v22, %v913_v23 }
0x11cb   :  { %917 = vrot.lane.b32.xlu1 %v915_v24, %s3954_s12  ;;  %v4245_v24 = vld [vmem:[%s4532_s6] sm:$0x1] }
0x123d   :  { %v918_v27 = vpop.permute.xlu1 %917 }
0x123e   :  { %v920_v28 = vadd.f32 %v918_v27, %v910_v26 }
0x1240   :  { %3693 = vtanh.f32 %v920_v28  ;;  %v1015_v46 = vrot.slane %v920_v28, 7 }
0x124d   :  { %v3694_v29 = vpop.eup %3693 }
0x124e   :  { %923 = vrot.lane.b32.xlu0 %v3694_v29, %s3954_s12 }
0x12c0   :  { %v924_v30 = vpop.permute.xlu0 %923 }
0x12c1   :  { %v926_v31 = vmul.f32 %v3692_v22, %v924_v30 }
0x12c3   :  { %v928_v32 = vrot.slane %v926_v31, 6  ;;  %v4183_v33 = vsel %vm1044_vm8, %v1043_v12, %v926_v31  ;;  %v1064_v12 = vsub.s32 1, %v1059_v8 }
0x12c5   :  { %929 = vrot.lane.b32.xlu1 %v928_v32, %s3955_s3  ;;  %v1065_v15 = vrot.slane %v1056_v11, %v1064_v12 }
0x1337   :  { %v930_v34 = vpop.permute.xlu1 %929 }
0x1338   :  { %3543 = vmatmul.mubr.msk.f32.vlgmr.msra.gmra.mxu0 %vm187_vm2, %v930_v34 }
0x1339   :  { %1218 = vmatprep.mubr.f32.mxu0 %v3952_v0 }
0x13f8   :  { %v999_v35 = vpop.f32.mrf.mxu0 }
0x13f9   :  { %v1004_v36 = vrot.slane %v999_v35, 1 }
0x13fa   :  { %v3544_v37 = vpop.f32.mrf.mxu0 }
0x13fb   :  { %v1006_v38 = vadd.f32 %v1004_v36, %v4082_v10  ;;  %v4191_v10 = vld [vmem:[#allocation10 + $0x38] sm:$0xff]  ;;  %v4267_v37 = vld [vmem:[%s4534_s8] sm:$0x1]  ;;  %s3956_s8 = smov [#allocation11]  }
0x13fc   :  { %1178 = vmatprep.subr.mxu0 %v4191_v10  ;;  %s3307_s19 = sshll.u32 %s3956_s8, 4  ;;  %s3308_s19 = int_to_ptr.vmem [resolvable:$true] %s3307_s19 }
0x13fd   :  { %3695 = vtanh.f32 %v1006_v38  ;;  %v3334_v40 = vmul.f32 -1.442695, %v1006_v38  ;;  %1179 = vmatpush1.msra.mxu0 %v4193_v50  ;;  %s3915_s20 = scalar_lea.vmem %s3308_s19, 128  ;;  %p3920_p12 = scmp.lt.s32.totalorder %s3308_s19, %s3308_s19 }
0x13fe   :  { %1180 = vmatprep.subr.mxu0 %v4196_v52  ;;  %p3916_p11 = scmp.ne.s32.totalorder %s3308_s19, %s3915_s20  ;;  %p3921_p13 = scmp.lt.s32.totalorder %s3915_s20, %s3915_s20 }
0x13ff   :  { %3697 = vpow2.f32 %v3334_v40  ;;  %1181 = vmatpush1.msra.mxu0 %v4198_v54 }
0x1400   :  { %1182 = vmatprep.subr.mxu0 %v4201_v56  ;;  %p3922_p0 = por %p3921_p13, %p3920_p12 }
0x1401   :  { %1183 = vmatpush1.msra.mxu0 %v4204_v2 }
0x1402   :  { %1184 = vmatprep.subr.mxu0 %v4207_v59  ;;  %p3923_p1 = pnand %p3922_p0, %p3916_p11 }
0x1403   :  { %1185 = vmatpush1.msra.mxu0 %v4210_v61 }
0x1404   :  { %1219 = vmatmul.mubr.f32.vlgmr.msra.gmra.mxu0 %v3952_v0  ;;  %3550 = vmatprep.subr.mxu0 %v3952_v0 }
0x1405   :  { %3552 = vmatprep.mubr.msk.f32.mxu0 %vm3953_vm0, %v3952_v0 }
0x140a   :  { %v3696_v39 = vpop.eup %3695 }
0x140b   :  { %1019 = vrot.lane.b32.xlu0 %v3696_v39, %s3954_s12 }
0x140c   :  { %v3698_v41 = vpop.eup %3697 }
0x140d   :  { %v1010_v42 = vadd.f32 1.0, %v3698_v41 }
0x140f   :  { %3699 = vrcp.f32 %v1010_v42 }
0x141c   :  { %v3700_v43 = vpop.eup %3699 }
0x141d   :  { %v1017_v47 = vmul.f32 %v3700_v43, %v1015_v46 }
0x147d   :  { %v1020_v44 = vpop.permute.xlu0 %1019 }
0x147e   :  { %v1022_v45 = vmul.f32 %v3700_v43, %v1020_v44 }
0x1480   :  { %1024 = vrot.lane.b32.xlu1 %v1022_v45, %s3954_s12 }
0x14c4   :  { %v1220_v13 = vpop.f32.mrf.mxu0 }
0x14c6   :  { %v1222_v17 = vpop.f32.mrf.mxu0 }
0x14c7   :  { %v1228_v20 = vrot.slane %v1222_v17, %v4227_v9 }
0x14f2   :  { %v1025_v48 = vpop.permute.xlu1 %1024 }
0x14f3   :  { %v1027_v49 = vadd.f32 %v1025_v48, %v1017_v47 }
0x14f5   :  { %3701 = vtanh.f32 %v1027_v49 }
0x1502   :  { %v3702_v62 = vpop.eup %3701 }
0x1503   :  { %1030 = vrot.lane.b32.xlu0 %v3702_v62, %s3954_s12 }
0x1575   :  { %v1031_v7 = vpop.permute.xlu0 %1030 }
0x1576   :  { %v1033_v63 = vmul.f32 %v3700_v43, %v1031_v7 }
0x1578   :  { %v1047_v1 = vsel %vm1046_vm9, %v4183_v33, %v1033_v63 }
0x1579   :  { %1069 = vrot.lane.b32.xlu1 %v1047_v1, %s3955_s3 }
0x15eb   :  { %v1070_v3 = vpop.permute.xlu1 %1069 }
0x15ec   :  { %3335 = vmatmul.mubr.msk.f32.vlgmr.msra.gmra.mxu1 %vm187_vm2, %v1070_v3 }
0x15ed   :  { %3547 = vmatprep.mubr.msk.f32.mxu1 %vm3953_vm0, %v3952_v0 }
0x16ac   :  { %v1139_v16 = vpop.f32.mrf.mxu1 }
0x16ad   :  { %v4233_v18 = vadd.f32 %v1139_v16, %v1061_v14 }
0x16ae   :  { %v1141_v19 = vpop.f32.mrf.mxu1 }
0x16af   :  { %v4236_v21 = vadd.f32 %v1141_v19, %v1065_v15  ;;  %3551 = vmatpush3.msra.mxu0 %v4233_v18 }
0x16b0   :  { %3555 = vmatprep.subr.mxu0 %v3952_v0 }
0x16b1   :  { %v1229_v22 = vadd.f32 %v1228_v20, %v4236_v21 }
0x16b3   :  { %3703 = vtanh.f32 %v1229_v22 }
0x16c0   :  { %v3704_v23 = vpop.eup %3703 }
0x16c1   :  { %3546 = vmatpush3.xpose.msk.msra.mxu1 %vm187_vm2, %v3704_v23 }
0x16c2   :  { %1448 = vmatprep.subr.mxu1 %v4191_v10 }
0x16c4   :  { %3548 = vmatmul.mubr.msk.f32.vlgmr.msra.gmra.mxu1 %vm187_vm2, %v4245_v24 }
0x16c5   :  { %1449 = vmatpush1.msra.mxu1 %v4193_v50  ;;  %1488 = vmatprep.mubr.f32.mxu1 %v3952_v0 }
0x16c6   :  { %1450 = vmatprep.subr.mxu1 %v4196_v52 }
0x16c7   :  { %1451 = vmatpush1.msra.mxu1 %v4198_v54 }
0x16c8   :  { %1452 = vmatprep.subr.mxu1 %v4201_v56 }
0x16c9   :  { %1453 = vmatpush1.msra.mxu1 %v4204_v2 }
0x16ca   :  { %1454 = vmatprep.subr.mxu1 %v4207_v59 }
0x16cb   :  { %1455 = vmatpush1.msra.mxu1 %v4210_v61 }
0x16cc   :  { %1713 = vmatprep.subr.mxu1 %v4191_v10 }
0x1784   :  { %v1303_v25 = vpop.f32.mrf.mxu1 }
0x1785   :  { %v1308_v26 = vsel %vm1307_vm10, %v1303_v25, -inf }
0x1786   :  { %1309 = vmax.xlane.f32.xlu0 %v1308_v26  ;;  %v3549_v27 = vpop.f32.mrf.mxu1 }
0x180f   :  { %v1310_v28 = vpop.xlane.xlu0 %1309 }
0x1810   :  { %v1311_v29 = vsub.f32 %v1303_v25, %v1310_v28 }
0x1812   :  { %v1312_v30 = vmul.f32 1.442695, %v1311_v29 }
0x1814   :  { %3705 = vpow2.f32 %v1312_v30 }
0x1821   :  { %v3706_v31 = vpop.eup %3705 }
0x1822   :  { %3553 = vmatmul.mubr.msk.f32.vlgmr.msra.gmra.mxu0 %vm1318_vm11, %v3706_v31  ;;  %v1314_v32 = vsel %vm1307_vm10, %v3706_v31, 0.0 }
0x1823   :  { %1315 = vadd.xlane.f32.xlu1 %v1314_v32  ;;  %3557 = vmatprep.mubr.msk.f32.mxu0 %vm3953_vm0, %v3952_v0 }
0x18ac   :  { %v1316_v33 = vpop.xlane.xlu1 %1315 }
0x18ad   :  { %3707 = vrcp.f32 %v1316_v33 }
0x18ba   :  { %v3708_v34 = vpop.eup %3707 }
0x18e2   :  { %v1388_v35 = vpop.f32.mrf.mxu0 }
0x18e3   :  { %v1392_v36 = vmul.f32 %v3708_v34, %v1388_v35 }
0x18e4   :  { %v3554_v38 = vpop.f32.mrf.mxu0 }
0x18e5   :  { %v1393_v39 = vadd.f32 %v1392_v36, %v1220_v13 }
0x18e7   :  { %v1394_v40 = vadd.f32 %v1393_v39, %v4267_v37 }
0x18e9   :  { %3709 = vtanh.f32 %v1394_v40  ;;  %v3339_v42 = vmul.f32 -1.442695, %v1394_v40 }
0x18eb   :  { %3711 = vpow2.f32 %v3339_v42 }
0x18f6   :  { %v3710_v41 = vpop.eup %3709 }
0x18f7   :  { %1404 = vrot.lane.b32.xlu0 %v3710_v41, %s3954_s12 }
0x18f8   :  { %v3712_v43 = vpop.eup %3711 }
0x18f9   :  { %v1398_v44 = vadd.f32 1.0, %v3712_v43 }
0x18fb   :  { %3713 = vrcp.f32 %v1398_v44 }
0x1908   :  { %v3714_v45 = vpop.eup %3713 }
0x1909   :  { %v1402_v48 = vmul.f32 0.0, %v3714_v45 }
0x1969   :  { %v1405_v46 = vpop.permute.xlu0 %1404 }
0x196a   :  { %v1407_v47 = vmul.f32 %v3714_v45, %v1405_v46 }
0x196c   :  { %1409 = vrot.lane.b32.xlu1 %v1407_v47, %s3954_s12 }
0x19de   :  { %v1410_v49 = vpop.permute.xlu1 %1409 }
0x19df   :  { %v4272_v51 = vadd.f32 %v1410_v49, %v1402_v48 }
0x19e1   :  { %3715 = vtanh.f32 %v4272_v51 }
0x19ee   :  { %v3716_v53 = vpop.eup %3715 }
0x19ef   :  { %1415 = vrot.lane.b32.xlu0 %v3716_v53, %s3954_s12 }
0x1a61   :  { %v1416_v55 = vpop.permute.xlu0 %1415 }
0x1a62   :  { %v4276_v57 = vmul.f32 %v3714_v45, %v1416_v55 }
0x1a64   :  { %1420 = vrot.lane.b32.xlu1 %v4276_v57, %s3955_s3 }
0x1ad6   :  { %v1421_v58 = vpop.permute.xlu1 %1420 }
0x1ad7   :  { %3340 = vmatmul.mubr.msk.f32.vlgmr.msra.gmra.mxu1 %vm187_vm2, %v1421_v58 }
0x1ad8   :  { %1714 = vmatpush1.msra.mxu1 %v4193_v50  ;;  %1753 = vmatprep.mubr.f32.mxu1 %v3952_v0 }
0x1ad9   :  { %1715 = vmatprep.subr.mxu1 %v4196_v52 }
0x1ada   :  { %1716 = vmatpush1.msra.mxu1 %v4198_v54 }
0x1adb   :  { %1717 = vmatprep.subr.mxu1 %v4201_v56 }
0x1adc   :  { %1718 = vmatpush1.msra.mxu1 %v4204_v2 }
0x1add   :  { %1719 = vmatprep.subr.mxu1 %v4207_v59 }
0x1ade   :  { %1720 = vmatpush1.msra.mxu1 %v4210_v61 }
0x1adf   :  { %1978 = vmatprep.subr.mxu1 %v4191_v10 }
0x1b97   :  { %v1490_v4 = vpop.f32.mrf.mxu1 }
0x1b99   :  { %v1492_v60 = vpop.f32.mrf.mxu1 }
0x1b9a   :  { %v1498_v6 = vrot.slane %v1492_v60, %v4227_v9 }
0x1b9c   :  { %v1499_v62 = vadd.f32 %v1498_v6, %v4236_v21 }
0x1b9e   :  { %3717 = vtanh.f32 %v1499_v62 }
0x1bab   :  { %v3718_v7 = vpop.eup %3717 }
0x1bac   :  { %3556 = vmatpush3.xpose.msk.msra.mxu0 %vm187_vm2, %v3718_v7 }
0x1bad   :  { %3560 = vmatprep.subr.mxu0 %v3952_v0 }
0x1baf   :  { %3558 = vmatmul.mubr.msk.f32.vlgmr.msra.gmra.mxu0 %vm187_vm2, %v4245_v24 }
0x1bb0   :  { %3561 = vmatpush3.msra.mxu0 %v4233_v18  ;;  %3562 = vmatprep.mubr.msk.f32.mxu0 %vm3953_vm0, %v3952_v0 }
0x1bb1   :  { %3565 = vmatprep.subr.mxu0 %v3952_v0 }
0x1c6f   :  { %v1570_v63 = vpop.f32.mrf.mxu0 }
0x1c70   :  { %v1574_v1 = vsel %vm1307_vm10, %v1570_v63, -inf }
0x1c71   :  { %1575 = vmax.xlane.f32.xlu0 %v1574_v1  ;;  %v3559_v3 = vpop.f32.mrf.mxu0 }
0x1cfa   :  { %v1576_v5 = vpop.xlane.xlu0 %1575 }
0x1cfb   :  { %v1577_v8 = vsub.f32 %v1570_v63, %v1576_v5 }
0x1cfd   :  { %v1578_v11 = vmul.f32 1.442695, %v1577_v8 }
0x1cff   :  { %3719 = vpow2.f32 %v1578_v11 }
0x1d0c   :  { %v3720_v12 = vpop.eup %3719 }
0x1d0d   :  { %3563 = vmatmul.mubr.msk.f32.vlgmr.msra.gmra.mxu0 %vm1318_vm11, %v3720_v12  ;;  %v1580_v13 = vsel %vm1307_vm10, %v3720_v12, 0.0 }
0x1d0e   :  { %1581 = vadd.xlane.f32.xlu1 %v1580_v13  ;;  %3567 = vmatprep.mubr.msk.f32.mxu0 %vm3953_vm0, %v3952_v0 }
0x1d97   :  { %v1582_v14 = vpop.xlane.xlu1 %1581 }
0x1d98   :  { %3721 = vrcp.f32 %v1582_v14 }
0x1da5   :  { %v3722_v15 = vpop.eup %3721 }
0x1dcd   :  { %v1653_v16 = vpop.f32.mrf.mxu0 }
0x1dce   :  { %v1657_v17 = vmul.f32 %v3722_v15, %v1653_v16 }
0x1dcf   :  { %v3564_v19 = vpop.f32.mrf.mxu0 }
0x1dd0   :  { %v1658_v20 = vadd.f32 %v1657_v17, %v1490_v4 }
0x1dd2   :  { %v1659_v22 = vadd.f32 %v1658_v20, %v4267_v37 }
0x1dd4   :  { %3723 = vtanh.f32 %v1659_v22  ;;  %v3344_v25 = vmul.f32 -1.442695, %v1659_v22 }
0x1dd6   :  { %3725 = vpow2.f32 %v3344_v25 }
0x1de1   :  { %v3724_v23 = vpop.eup %3723 }
0x1de2   :  { %1669 = vrot.lane.b32.xlu0 %v3724_v23, %s3954_s12 }
0x1de3   :  { %v3726_v26 = vpop.eup %3725 }
0x1de4   :  { %v1663_v27 = vadd.f32 1.0, %v3726_v26 }
0x1de6   :  { %3727 = vrcp.f32 %v1663_v27 }
0x1df3   :  { %v3728_v28 = vpop.eup %3727 }
0x1df4   :  { %v1667_v31 = vmul.f32 %v3728_v28, %v4272_v51 }
0x1e54   :  { %v1670_v29 = vpop.permute.xlu0 %1669 }
0x1e55   :  { %v1672_v30 = vmul.f32 %v3728_v28, %v1670_v29 }
0x1e57   :  { %1674 = vrot.lane.b32.xlu1 %v1672_v30, %s3954_s12 }
0x1ec9   :  { %v1675_v32 = vpop.permute.xlu1 %1674 }
0x1eca   :  { %v4309_v33 = vadd.f32 %v1675_v32, %v1667_v31 }
0x1ecc   :  { %3729 = vtanh.f32 %v4309_v33 }
0x1ed9   :  { %v3730_v34 = vpop.eup %3729 }
0x1eda   :  { %1680 = vrot.lane.b32.xlu0 %v3730_v34, %s3954_s12 }
0x1f4c   :  { %v1681_v35 = vpop.permute.xlu0 %1680 }
0x1f4d   :  { %v4313_v36 = vmul.f32 %v3728_v28, %v1681_v35 }
0x1f4f   :  { %1685 = vrot.lane.b32.xlu1 %v4313_v36, %s3955_s3  ;;  %v3274_v17 = vrot.slane %v4313_v36, 7 }
0x1f51   :  { %v3289_v23 = vsel %vm1034_vm3, %v4276_v57, %v3274_v17 }
0x1fc1   :  { %v1686_v38 = vpop.permute.xlu1 %1685 }
0x1fc2   :  { %3345 = vmatmul.mubr.msk.f32.vlgmr.msra.gmra.mxu1 %vm187_vm2, %v1686_v38 }
0x1fc3   :  { %1979 = vmatpush1.msra.mxu1 %v4193_v50  ;;  %2018 = vmatprep.mubr.f32.mxu1 %v3952_v0 }
0x1fc4   :  { %1980 = vmatprep.subr.mxu1 %v4196_v52 }
0x1fc5   :  { %1981 = vmatpush1.msra.mxu1 %v4198_v54 }
0x1fc6   :  { %1982 = vmatprep.subr.mxu1 %v4201_v56 }
0x1fc7   :  { %1983 = vmatpush1.msra.mxu1 %v4204_v2 }
0x1fc8   :  { %1984 = vmatprep.subr.mxu1 %v4207_v59 }
0x1fc9   :  { %1985 = vmatpush1.msra.mxu1 %v4210_v61 }
0x1fca   :  { %2243 = vmatprep.subr.mxu1 %v4191_v10 }
0x2082   :  { %v1755_v39 = vpop.f32.mrf.mxu1 }
0x2084   :  { %v1757_v40 = vpop.f32.mrf.mxu1 }
0x2085   :  { %v1763_v41 = vrot.slane %v1757_v40, %v4227_v9 }
0x2087   :  { %v1764_v42 = vadd.f32 %v1763_v41, %v4236_v21 }
0x2089   :  { %3731 = vtanh.f32 %v1764_v42 }
0x2096   :  { %v3732_v43 = vpop.eup %3731 }
0x2097   :  { %3566 = vmatpush3.xpose.msk.msra.mxu0 %vm187_vm2, %v3732_v43 }
0x2098   :  { %3570 = vmatprep.subr.mxu0 %v3952_v0 }
0x209a   :  { %3568 = vmatmul.mubr.msk.f32.vlgmr.msra.gmra.mxu0 %vm187_vm2, %v4245_v24 }
0x209b   :  { %3571 = vmatpush3.msra.mxu0 %v4233_v18  ;;  %3572 = vmatprep.mubr.msk.f32.mxu0 %vm3953_vm0, %v3952_v0 }
0x209c   :  { %3575 = vmatprep.subr.mxu0 %v3952_v0 }
0x215a   :  { %v1835_v44 = vpop.f32.mrf.mxu0 }
0x215b   :  { %v1839_v45 = vsel %vm1307_vm10, %v1835_v44, -inf }
0x215c   :  { %1840 = vmax.xlane.f32.xlu0 %v1839_v45  ;;  %v3569_v46 = vpop.f32.mrf.mxu0 }
0x21e5   :  { %v1841_v47 = vpop.xlane.xlu0 %1840 }
0x21e6   :  { %v1842_v48 = vsub.f32 %v1835_v44, %v1841_v47 }
0x21e8   :  { %v1843_v49 = vmul.f32 1.442695, %v1842_v48 }
0x21ea   :  { %3733 = vpow2.f32 %v1843_v49 }
0x21f7   :  { %v3734_v51 = vpop.eup %3733 }
0x21f8   :  { %3573 = vmatmul.mubr.msk.f32.vlgmr.msra.gmra.mxu0 %vm1318_vm11, %v3734_v51  ;;  %v1845_v53 = vsel %vm1307_vm10, %v3734_v51, 0.0 }
0x21f9   :  { %1846 = vadd.xlane.f32.xlu1 %v1845_v53  ;;  %3577 = vmatprep.mubr.msk.f32.mxu0 %vm3953_vm0, %v3952_v0 }
0x2282   :  { %v1847_v55 = vpop.xlane.xlu1 %1846 }
0x2283   :  { %3735 = vrcp.f32 %v1847_v55 }
0x2290   :  { %v3736_v58 = vpop.eup %3735 }
0x22b8   :  { %v1918_v4 = vpop.f32.mrf.mxu0 }
0x22b9   :  { %v1922_v60 = vmul.f32 %v3736_v58, %v1918_v4 }
0x22ba   :  { %v3574_v6 = vpop.f32.mrf.mxu0 }
0x22bb   :  { %v1923_v62 = vadd.f32 %v1922_v60, %v1755_v39 }
0x22bd   :  { %v1924_v7 = vadd.f32 %v1923_v62, %v4267_v37 }
0x22bf   :  { %3737 = vtanh.f32 %v1924_v7  ;;  %v3349_v1 = vmul.f32 -1.442695, %v1924_v7 }
0x22c1   :  { %3739 = vpow2.f32 %v3349_v1 }
0x22cc   :  { %v3738_v63 = vpop.eup %3737 }
0x22cd   :  { %1934 = vrot.lane.b32.xlu0 %v3738_v63, %s3954_s12 }
0x22ce   :  { %v3740_v3 = vpop.eup %3739 }
0x22cf   :  { %v1928_v5 = vadd.f32 1.0, %v3740_v3 }
0x22d1   :  { %3741 = vrcp.f32 %v1928_v5 }
0x22de   :  { %v3742_v8 = vpop.eup %3741 }
0x22df   :  { %v1932_v13 = vmul.f32 %v3742_v8, %v4309_v33 }
0x233f   :  { %v1935_v11 = vpop.permute.xlu0 %1934 }
0x2340   :  { %v1937_v12 = vmul.f32 %v3742_v8, %v1935_v11 }
0x2342   :  { %1939 = vrot.lane.b32.xlu1 %v1937_v12, %s3954_s12 }
0x23b4   :  { %v1940_v14 = vpop.permute.xlu1 %1939 }
0x23b5   :  { %v4346_v15 = vadd.f32 %v1940_v14, %v1932_v13 }
0x23b7   :  { %3743 = vtanh.f32 %v4346_v15 }
0x23c4   :  { %v3744_v16 = vpop.eup %3743 }
0x23c5   :  { %1945 = vrot.lane.b32.xlu0 %v3744_v16, %s3954_s12 }
0x2437   :  { %v1946_v19 = vpop.permute.xlu0 %1945 }
0x2438   :  { %v1948_v20 = vmul.f32 %v3742_v8, %v1946_v19 }
0x243a   :  { %v3276_v22 = vrot.slane %v1948_v20, 6  ;;  %1950 = vrot.lane.b32.xlu1 %v1948_v20, %s3955_s3 }
0x243c   :  { %v4355_v25 = vsel %vm1036_vm4, %v3289_v23, %v3276_v22 }
0x24ac   :  { %v1951_v26 = vpop.permute.xlu1 %1950 }
0x24ad   :  { %3350 = vmatmul.mubr.msk.f32.vlgmr.msra.gmra.mxu1 %vm187_vm2, %v1951_v26 }
0x24ae   :  { %2244 = vmatpush1.msra.mxu1 %v4193_v50  ;;  %2283 = vmatprep.mubr.f32.mxu1 %v3952_v0 }
0x24af   :  { %2245 = vmatprep.subr.mxu1 %v4196_v52 }
0x24b0   :  { %2246 = vmatpush1.msra.mxu1 %v4198_v54 }
0x24b1   :  { %2247 = vmatprep.subr.mxu1 %v4201_v56 }
0x24b2   :  { %2248 = vmatpush1.msra.mxu1 %v4204_v2 }
0x24b3   :  { %2249 = vmatprep.subr.mxu1 %v4207_v59 }
0x24b4   :  { %2250 = vmatpush1.msra.mxu1 %v4210_v61 }
0x24b5   :  { %2508 = vmatprep.subr.mxu1 %v4191_v10 }
0x256d   :  { %v2020_v57 = vpop.f32.mrf.mxu1 }
0x256f   :  { %v2022_v27 = vpop.f32.mrf.mxu1 }
0x2570   :  { %v2028_v28 = vrot.slane %v2022_v27, %v4227_v9 }
0x2572   :  { %v2029_v29 = vadd.f32 %v2028_v28, %v4236_v21 }
0x2574   :  { %3745 = vtanh.f32 %v2029_v29 }
0x2581   :  { %v3746_v30 = vpop.eup %3745 }
0x2582   :  { %3576 = vmatpush3.xpose.msk.msra.mxu0 %vm187_vm2, %v3746_v30 }
0x2583   :  { %3580 = vmatprep.subr.mxu0 %v3952_v0 }
0x2585   :  { %3578 = vmatmul.mubr.msk.f32.vlgmr.msra.gmra.mxu0 %vm187_vm2, %v4245_v24 }
0x2586   :  { %3581 = vmatpush3.msra.mxu0 %v4233_v18  ;;  %3582 = vmatprep.mubr.msk.f32.mxu0 %vm3953_vm0, %v3952_v0 }
0x2587   :  { %3585 = vmatprep.subr.mxu0 %v3952_v0 }
0x2645   :  { %v2100_v31 = vpop.f32.mrf.mxu0 }
0x2646   :  { %v2104_v32 = vsel %vm1307_vm10, %v2100_v31, -inf }
0x2647   :  { %2105 = vmax.xlane.f32.xlu0 %v2104_v32  ;;  %v3579_v33 = vpop.f32.mrf.mxu0 }
0x26d0   :  { %v2106_v34 = vpop.xlane.xlu0 %2105 }
0x26d1   :  { %v2107_v35 = vsub.f32 %v2100_v31, %v2106_v34 }
0x26d3   :  { %v2108_v36 = vmul.f32 1.442695, %v2107_v35 }
0x26d5   :  { %3747 = vpow2.f32 %v2108_v36 }
0x26e2   :  { %v3748_v38 = vpop.eup %3747 }
0x26e3   :  { %3583 = vmatmul.mubr.msk.f32.vlgmr.msra.gmra.mxu0 %vm1318_vm11, %v3748_v38  ;;  %v2110_v39 = vsel %vm1307_vm10, %v3748_v38, 0.0 }
0x26e4   :  { %2111 = vadd.xlane.f32.xlu1 %v2110_v39  ;;  %3587 = vmatprep.mubr.msk.f32.mxu0 %vm3953_vm0, %v3952_v0 }
0x276d   :  { %v2112_v40 = vpop.xlane.xlu1 %2111 }
0x276e   :  { %3749 = vrcp.f32 %v2112_v40 }
0x277b   :  { %v3750_v41 = vpop.eup %3749 }
0x27a3   :  { %v2183_v42 = vpop.f32.mrf.mxu0 }
0x27a4   :  { %v2187_v43 = vmul.f32 %v3750_v41, %v2183_v42 }
0x27a5   :  { %v3584_v44 = vpop.f32.mrf.mxu0 }
0x27a6   :  { %v2188_v45 = vadd.f32 %v2187_v43, %v2020_v57 }
0x27a8   :  { %v2189_v46 = vadd.f32 %v2188_v45, %v4267_v37 }
0x27aa   :  { %3751 = vtanh.f32 %v2189_v46  ;;  %v3354_v48 = vmul.f32 -1.442695, %v2189_v46 }
0x27ac   :  { %3753 = vpow2.f32 %v3354_v48 }
0x27b7   :  { %v3752_v47 = vpop.eup %3751 }
0x27b8   :  { %2199 = vrot.lane.b32.xlu0 %v3752_v47, %s3954_s12 }
0x27b9   :  { %v3754_v49 = vpop.eup %3753 }
0x27ba   :  { %v2193_v51 = vadd.f32 1.0, %v3754_v49 }
0x27bc   :  { %3755 = vrcp.f32 %v2193_v51 }
0x27c9   :  { %v3756_v53 = vpop.eup %3755 }
0x27ca   :  { %v2197_v4 = vmul.f32 %v3756_v53, %v4346_v15 }
0x282a   :  { %v2200_v55 = vpop.permute.xlu0 %2199 }
0x282b   :  { %v2202_v58 = vmul.f32 %v3756_v53, %v2200_v55 }
0x282d   :  { %2204 = vrot.lane.b32.xlu1 %v2202_v58, %s3954_s12 }
0x289f   :  { %v2205_v60 = vpop.permute.xlu1 %2204 }
0x28a0   :  { %v4386_v6 = vadd.f32 %v2205_v60, %v2197_v4 }
0x28a2   :  { %3757 = vtanh.f32 %v4386_v6 }
0x28af   :  { %v3758_v62 = vpop.eup %3757 }
0x28b0   :  { %2210 = vrot.lane.b32.xlu0 %v3758_v62, %s3954_s12 }
0x2922   :  { %v2211_v7 = vpop.permute.xlu0 %2210 }
0x2923   :  { %v2213_v63 = vmul.f32 %v3756_v53, %v2211_v7 }
0x2925   :  { %v3278_v1 = vrot.slane %v2213_v63, 5  ;;  %2215 = vrot.lane.b32.xlu1 %v2213_v63, %s3955_s3 }
0x2927   :  { %v4393_v3 = vsel %vm1038_vm5, %v4355_v25, %v3278_v1 }
0x2997   :  { %v2216_v5 = vpop.permute.xlu1 %2215 }
0x2998   :  { %3355 = vmatmul.mubr.msk.f32.vlgmr.msra.gmra.mxu1 %vm187_vm2, %v2216_v5 }
0x2999   :  { %2509 = vmatpush1.msra.mxu1 %v4193_v50  ;;  %2548 = vmatprep.mubr.f32.mxu1 %v3952_v0 }
0x299a   :  { %2510 = vmatprep.subr.mxu1 %v4196_v52 }
0x299b   :  { %2511 = vmatpush1.msra.mxu1 %v4198_v54 }
0x299c   :  { %2512 = vmatprep.subr.mxu1 %v4201_v56 }
0x299d   :  { %2513 = vmatpush1.msra.mxu1 %v4204_v2 }
0x299e   :  { %2514 = vmatprep.subr.mxu1 %v4207_v59 }
0x299f   :  { %2515 = vmatpush1.msra.mxu1 %v4210_v61 }
0x29a0   :  { %2773 = vmatprep.subr.mxu1 %v4191_v10 }
0x2a58   :  { %v2285_v8 = vpop.f32.mrf.mxu1 }
0x2a5a   :  { %v2287_v11 = vpop.f32.mrf.mxu1 }
0x2a5b   :  { %v2293_v12 = vrot.slane %v2287_v11, %v4227_v9 }
0x2a5d   :  { %v2294_v13 = vadd.f32 %v2293_v12, %v4236_v21 }
0x2a5f   :  { %3759 = vtanh.f32 %v2294_v13 }
0x2a6c   :  { %v3760_v14 = vpop.eup %3759 }
0x2a6d   :  { %3586 = vmatpush3.xpose.msk.msra.mxu0 %vm187_vm2, %v3760_v14 }
0x2a6e   :  { %3590 = vmatprep.subr.mxu0 %v3952_v0 }
0x2a70   :  { %3588 = vmatmul.mubr.msk.f32.vlgmr.msra.gmra.mxu0 %vm187_vm2, %v4245_v24 }
0x2a71   :  { %3591 = vmatpush3.msra.mxu0 %v4233_v18  ;;  %3592 = vmatprep.mubr.msk.f32.mxu0 %vm3953_vm0, %v3952_v0 }
0x2a72   :  { %3595 = vmatprep.subr.mxu0 %v3952_v0 }
0x2b30   :  { %v2365_v15 = vpop.f32.mrf.mxu0 }
0x2b31   :  { %v2369_v16 = vsel %vm1307_vm10, %v2365_v15, -inf }
0x2b32   :  { %2370 = vmax.xlane.f32.xlu0 %v2369_v16  ;;  %v3589_v17 = vpop.f32.mrf.mxu0 }
0x2bbb   :  { %v2371_v19 = vpop.xlane.xlu0 %2370 }
0x2bbc   :  { %v2372_v20 = vsub.f32 %v2365_v15, %v2371_v19 }
0x2bbe   :  { %v2373_v22 = vmul.f32 1.442695, %v2372_v20 }
0x2bc0   :  { %3761 = vpow2.f32 %v2373_v22 }
0x2bcd   :  { %v3762_v23 = vpop.eup %3761 }
0x2bce   :  { %3593 = vmatmul.mubr.msk.f32.vlgmr.msra.gmra.mxu0 %vm1318_vm11, %v3762_v23  ;;  %v2375_v25 = vsel %vm1307_vm10, %v3762_v23, 0.0 }
0x2bcf   :  { %2376 = vadd.xlane.f32.xlu1 %v2375_v25  ;;  %3597 = vmatprep.mubr.msk.f32.mxu0 %vm3953_vm0, %v3952_v0 }
0x2c58   :  { %v2377_v26 = vpop.xlane.xlu1 %2376 }
0x2c59   :  { %3763 = vrcp.f32 %v2377_v26 }
0x2c66   :  { %v3764_v57 = vpop.eup %3763 }
0x2c8e   :  { %v2448_v27 = vpop.f32.mrf.mxu0 }
0x2c8f   :  { %v2452_v28 = vmul.f32 %v3764_v57, %v2448_v27 }
0x2c90   :  { %v3594_v29 = vpop.f32.mrf.mxu0 }
0x2c91   :  { %v2453_v30 = vadd.f32 %v2452_v28, %v2285_v8 }
0x2c93   :  { %v2454_v31 = vadd.f32 %v2453_v30, %v4267_v37 }
0x2c95   :  { %3765 = vtanh.f32 %v2454_v31  ;;  %v3359_v33 = vmul.f32 -1.442695, %v2454_v31 }
0x2c97   :  { %3767 = vpow2.f32 %v3359_v33 }
0x2ca2   :  { %v3766_v32 = vpop.eup %3765 }
0x2ca3   :  { %2464 = vrot.lane.b32.xlu0 %v3766_v32, %s3954_s12 }
0x2ca4   :  { %v3768_v34 = vpop.eup %3767 }
0x2ca5   :  { %v2458_v35 = vadd.f32 1.0, %v3768_v34 }
0x2ca7   :  { %3769 = vrcp.f32 %v2458_v35 }
0x2cb4   :  { %v3770_v36 = vpop.eup %3769 }
0x2cb5   :  { %v2462_v40 = vmul.f32 %v3770_v36, %v4386_v6 }
0x2d15   :  { %v2465_v38 = vpop.permute.xlu0 %2464 }
0x2d16   :  { %v2467_v39 = vmul.f32 %v3770_v36, %v2465_v38 }
0x2d18   :  { %2469 = vrot.lane.b32.xlu1 %v2467_v39, %s3954_s12 }
0x2d8a   :  { %v2470_v41 = vpop.permute.xlu1 %2469 }
0x2d8b   :  { %v4424_v42 = vadd.f32 %v2470_v41, %v2462_v40 }
0x2d8d   :  { %3771 = vtanh.f32 %v4424_v42 }
0x2d9a   :  { %v3772_v43 = vpop.eup %3771 }
0x2d9b   :  { %2475 = vrot.lane.b32.xlu0 %v3772_v43, %s3954_s12 }
0x2e0d   :  { %v2476_v44 = vpop.permute.xlu0 %2475 }
0x2e0e   :  { %v2478_v45 = vmul.f32 %v3770_v36, %v2476_v44 }
0x2e10   :  { %v3280_v46 = vrot.slane %v2478_v45, 4  ;;  %2480 = vrot.lane.b32.xlu1 %v2478_v45, %s3955_s3 }
0x2e12   :  { %v4431_v47 = vsel %vm1040_vm6, %v4393_v3, %v3280_v46 }
0x2e82   :  { %v2481_v48 = vpop.permute.xlu1 %2480 }
0x2e83   :  { %3360 = vmatmul.mubr.msk.f32.vlgmr.msra.gmra.mxu1 %vm187_vm2, %v2481_v48 }
0x2e84   :  { %2774 = vmatpush1.msra.mxu1 %v4193_v50  ;;  %2813 = vmatprep.mubr.f32.mxu1 %v3952_v0 }
0x2e85   :  { %2775 = vmatprep.subr.mxu1 %v4196_v52 }
0x2e86   :  { %2776 = vmatpush1.msra.mxu1 %v4198_v54 }
0x2e87   :  { %2777 = vmatprep.subr.mxu1 %v4201_v56 }
0x2e88   :  { %2778 = vmatpush1.msra.mxu1 %v4204_v2 }
0x2e89   :  { %2779 = vmatprep.subr.mxu1 %v4207_v59 }
0x2e8a   :  { %2780 = vmatpush1.msra.mxu1 %v4210_v61 }
0x2e8b   :  { %3038 = vmatprep.subr.mxu1 %v4191_v10 }
0x2f43   :  { %v2550_v49 = vpop.f32.mrf.mxu1 }
0x2f45   :  { %v2552_v51 = vpop.f32.mrf.mxu1 }
0x2f46   :  { %v2558_v53 = vrot.slane %v2552_v51, %v4227_v9 }
0x2f48   :  { %v2559_v55 = vadd.f32 %v2558_v53, %v4236_v21 }
0x2f4a   :  { %3773 = vtanh.f32 %v2559_v55 }
0x2f57   :  { %v3774_v58 = vpop.eup %3773 }
0x2f58   :  { %3596 = vmatpush3.xpose.msk.msra.mxu0 %vm187_vm2, %v3774_v58 }
0x2f59   :  { %3600 = vmatprep.subr.mxu0 %v3952_v0 }
0x2f5b   :  { %3598 = vmatmul.mubr.msk.f32.vlgmr.msra.gmra.mxu0 %vm187_vm2, %v4245_v24 }
0x2f5c   :  { %3601 = vmatpush3.msra.mxu0 %v4233_v18  ;;  %3602 = vmatprep.mubr.msk.f32.mxu0 %vm3953_vm0, %v3952_v0 }
0x2f5d   :  { %3605 = vmatprep.subr.mxu0 %v3952_v0 }
0x301b   :  { %v2630_v10 = vpop.f32.mrf.mxu0 }
0x301c   :  { %v2634_v4 = vsel %vm1307_vm10, %v2630_v10, -inf }
0x301d   :  { %2635 = vmax.xlane.f32.xlu0 %v2634_v4  ;;  %v3599_v60 = vpop.f32.mrf.mxu0 }
0x30a6   :  { %v2636_v6 = vpop.xlane.xlu0 %2635 }
0x30a7   :  { %v2637_v62 = vsub.f32 %v2630_v10, %v2636_v6 }
0x30a9   :  { %v2638_v7 = vmul.f32 1.442695, %v2637_v62 }
0x30ab   :  { %3775 = vpow2.f32 %v2638_v7 }
0x30b8   :  { %v3776_v63 = vpop.eup %3775 }
0x30b9   :  { %3603 = vmatmul.mubr.msk.f32.vlgmr.msra.gmra.mxu0 %vm1318_vm11, %v3776_v63  ;;  %v2640_v1 = vsel %vm1307_vm10, %v3776_v63, 0.0 }
0x30ba   :  { %2641 = vadd.xlane.f32.xlu1 %v2640_v1  ;;  %3607 = vmatprep.mubr.msk.f32.mxu0 %vm3953_vm0, %v3952_v0 }
0x3143   :  { %v2642_v3 = vpop.xlane.xlu1 %2641 }
0x3144   :  { %3777 = vrcp.f32 %v2642_v3 }
0x3151   :  { %v3778_v5 = vpop.eup %3777 }
0x3179   :  { %v2713_v8 = vpop.f32.mrf.mxu0 }
0x317a   :  { %v2717_v11 = vmul.f32 %v3778_v5, %v2713_v8 }
0x317b   :  { %v3604_v12 = vpop.f32.mrf.mxu0 }
0x317c   :  { %v2718_v13 = vadd.f32 %v2717_v11, %v2550_v49 }
0x317e   :  { %v2719_v14 = vadd.f32 %v2718_v13, %v4267_v37 }
0x3180   :  { %3779 = vtanh.f32 %v2719_v14  ;;  %v3364_v16 = vmul.f32 -1.442695, %v2719_v14 }
0x3182   :  { %3781 = vpow2.f32 %v3364_v16 }
0x318d   :  { %v3780_v15 = vpop.eup %3779 }
0x318e   :  { %2729 = vrot.lane.b32.xlu0 %v3780_v15, %s3954_s12 }
0x318f   :  { %v3782_v17 = vpop.eup %3781 }
0x3190   :  { %v2723_v19 = vadd.f32 1.0, %v3782_v17 }
0x3192   :  { %3783 = vrcp.f32 %v2723_v19 }
0x319f   :  { %v3784_v20 = vpop.eup %3783 }
0x31a0   :  { %v2727_v25 = vmul.f32 %v3784_v20, %v4424_v42 }
0x3200   :  { %v2730_v22 = vpop.permute.xlu0 %2729 }
0x3201   :  { %v2732_v23 = vmul.f32 %v3784_v20, %v2730_v22 }
0x3203   :  { %2734 = vrot.lane.b32.xlu1 %v2732_v23, %s3954_s12 }
0x3275   :  { %v2735_v26 = vpop.permute.xlu1 %2734 }
0x3276   :  { %v4462_v57 = vadd.f32 %v2735_v26, %v2727_v25 }
0x3278   :  { %3785 = vtanh.f32 %v4462_v57 }
0x3285   :  { %v3786_v27 = vpop.eup %3785 }
0x3286   :  { %2740 = vrot.lane.b32.xlu0 %v3786_v27, %s3954_s12 }
0x32f8   :  { %v2741_v28 = vpop.permute.xlu0 %2740 }
0x32f9   :  { %v2743_v29 = vmul.f32 %v3784_v20, %v2741_v28 }
0x32fb   :  { %v3282_v30 = vrot.slane %v2743_v29, 3  ;;  %2745 = vrot.lane.b32.xlu1 %v2743_v29, %s3955_s3 }
0x32fd   :  { %v4469_v31 = vsel %vm1042_vm7, %v4431_v47, %v3282_v30 }
0x336d   :  { %v2746_v32 = vpop.permute.xlu1 %2745 }
0x336e   :  { %3365 = vmatmul.mubr.msk.f32.vlgmr.msra.gmra.mxu1 %vm187_vm2, %v2746_v32 }
0x336f   :  { %3039 = vmatpush1.msra.mxu1 %v4193_v50  ;;  %3078 = vmatprep.mubr.f32.mxu1 %v3952_v0 }
0x3370   :  { %3040 = vmatprep.subr.mxu1 %v4196_v52 }
0x3371   :  { %3041 = vmatpush1.msra.mxu1 %v4198_v54 }
0x3372   :  { %3042 = vmatprep.subr.mxu1 %v4201_v56 }
0x3373   :  { %3043 = vmatpush1.msra.mxu1 %v4204_v2 }
0x3374   :  { %3044 = vmatprep.subr.mxu1 %v4207_v59 }
0x3375   :  { %3045 = vmatpush1.msra.mxu1 %v4210_v61 }
0x342e   :  { %v2815_v33 = vpop.f32.mrf.mxu1 }
0x3430   :  { %v2817_v34 = vpop.f32.mrf.mxu1 }
0x3431   :  { %v2823_v35 = vrot.slane %v2817_v34, %v4227_v9 }
0x3433   :  { %v2824_v50 = vadd.f32 %v2823_v35, %v4236_v21 }
0x3435   :  { %3787 = vtanh.f32 %v2824_v50 }
0x3442   :  { %v3788_v36 = vpop.eup %3787 }
0x3443   :  { %3606 = vmatpush3.xpose.msk.msra.mxu0 %vm187_vm2, %v3788_v36 }
0x3444   :  { %3610 = vmatprep.subr.mxu0 %v3952_v0 }
0x3446   :  { %3608 = vmatmul.mubr.msk.f32.vlgmr.msra.gmra.mxu0 %vm187_vm2, %v4245_v24 }
0x3447   :  { %3611 = vmatpush3.msra.mxu0 %v4233_v18  ;;  %3612 = vmatprep.mubr.msk.f32.mxu0 %vm3953_vm0, %v3952_v0 }
0x3448   :  { %3615 = vmatprep.subr.mxu0 %v3952_v0 }
0x3506   :  { %v2895_v52 = vpop.f32.mrf.mxu0 }
0x3507   :  { %v2899_v54 = vsel %vm1307_vm10, %v2895_v52, -inf }
0x3508   :  { %2900 = vmax.xlane.f32.xlu0 %v2899_v54  ;;  %v3609_v56 = vpop.f32.mrf.mxu0 }
0x3591   :  { %v2901_v2 = vpop.xlane.xlu0 %2900 }
0x3592   :  { %v2902_v59 = vsub.f32 %v2895_v52, %v2901_v2 }
0x3594   :  { %v2903_v61 = vmul.f32 1.442695, %v2902_v59 }
0x3596   :  { %3789 = vpow2.f32 %v2903_v61 }
0x35a3   :  { %v3790_v38 = vpop.eup %3789 }
0x35a4   :  { %3613 = vmatmul.mubr.msk.f32.vlgmr.msra.gmra.mxu0 %vm1318_vm11, %v3790_v38  ;;  %v2905_v39 = vsel %vm1307_vm10, %v3790_v38, 0.0 }
0x35a5   :  { %2906 = vadd.xlane.f32.xlu1 %v2905_v39  ;;  %3617 = vmatprep.mubr.msk.f32.mxu0 %vm3953_vm0, %v3952_v0 }
0x362e   :  { %v2907_v40 = vpop.xlane.xlu1 %2906 }
0x362f   :  { %3791 = vrcp.f32 %v2907_v40 }
0x363c   :  { %v3792_v41 = vpop.eup %3791 }
0x3664   :  { %v2978_v42 = vpop.f32.mrf.mxu0 }
0x3665   :  { %v2982_v43 = vmul.f32 %v3792_v41, %v2978_v42 }
0x3666   :  { %v3614_v44 = vpop.f32.mrf.mxu0 }
0x3667   :  { %v2983_v45 = vadd.f32 %v2982_v43, %v2815_v33 }
0x3669   :  { %v2984_v46 = vadd.f32 %v2983_v45, %v4267_v37 }
0x366b   :  { %3793 = vtanh.f32 %v2984_v46  ;;  %v3369_v48 = vmul.f32 -1.442695, %v2984_v46 }
0x366d   :  { %3795 = vpow2.f32 %v3369_v48 }
0x3678   :  { %v3794_v47 = vpop.eup %3793 }
0x3679   :  { %2994 = vrot.lane.b32.xlu0 %v3794_v47, %s3954_s12 }
0x367a   :  { %v3796_v49 = vpop.eup %3795 }
0x367b   :  { %v2988_v51 = vadd.f32 1.0, %v3796_v49 }
0x367d   :  { %3797 = vrcp.f32 %v2988_v51 }
0x368a   :  { %v3798_v53 = vpop.eup %3797 }
0x368b   :  { %v2992_v10 = vmul.f32 %v3798_v53, %v4462_v57 }
0x36eb   :  { %v2995_v55 = vpop.permute.xlu0 %2994 }
0x36ec   :  { %v2997_v58 = vmul.f32 %v3798_v53, %v2995_v55 }
0x36ee   :  { %2999 = vrot.lane.b32.xlu1 %v2997_v58, %s3954_s12 }
0x3760   :  { %v3000_v4 = vpop.permute.xlu1 %2999 }
0x3761   :  { %v3002_v60 = vadd.f32 %v3000_v4, %v2992_v10 }
0x3763   :  { %3799 = vtanh.f32 %v3002_v60 }
0x3770   :  { %v3800_v6 = vpop.eup %3799 }
0x3771   :  { %3005 = vrot.lane.b32.xlu0 %v3800_v6, %s3954_s12 }
0x37e3   :  { %v3006_v62 = vpop.permute.xlu0 %3005 }
0x37e4   :  { %v3008_v7 = vmul.f32 %v3798_v53, %v3006_v62 }
0x37e6   :  { %v3284_v63 = vrot.slane %v3008_v7, 2  ;;  %3010 = vrot.lane.b32.xlu1 %v3008_v7, %s3955_s3 }
0x37e8   :  { %v3294_v1 = vsel %vm1044_vm8, %v4469_v31, %v3284_v63 }
0x3858   :  { %v3011_v3 = vpop.permute.xlu1 %3010 }
0x3859   :  { %3370 = vmatmul.mubr.msk.f32.vlgmr.msra.gmra.mxu1 %vm187_vm2, %v3011_v3 }
0x3919   :  { %v3080_v5 = vpop.f32.mrf.mxu1 }
0x391b   :  { %v3082_v8 = vpop.f32.mrf.mxu1 }
0x391c   :  { %v3088_v11 = vrot.slane %v3082_v8, %v4227_v9 }
0x391e   :  { %v3089_v12 = vadd.f32 %v3088_v11, %v4236_v21 }
0x3920   :  { %3801 = vtanh.f32 %v3089_v12 }
0x392d   :  { %v3802_v13 = vpop.eup %3801 }
0x392e   :  { %3616 = vmatpush3.xpose.msk.msra.mxu0 %vm187_vm2, %v3802_v13 }
0x392f   :  { %3620 = vmatprep.subr.mxu0 %v3952_v0 }
0x3931   :  { %3618 = vmatmul.mubr.msk.f32.vlgmr.msra.gmra.mxu0 %vm187_vm2, %v4245_v24 }
0x3932   :  { %3621 = vmatpush3.msra.mxu0 %v4233_v18  ;;  %3622 = vmatprep.mubr.msk.f32.mxu0 %vm3953_vm0, %v3952_v0 }
0x39f1   :  { %v3160_v14 = vpop.f32.mrf.mxu0 }
0x39f2   :  { %v3164_v15 = vsel %vm1307_vm10, %v3160_v14, -inf }
0x39f3   :  { %3165 = vmax.xlane.f32.xlu0 %v3164_v15  ;;  %v3619_v9 = vpop.f32.mrf.mxu0 }
0x3a7c   :  { %v3166_v21 = vpop.xlane.xlu0 %3165 }
0x3a7d   :  { %v3167_v16 = vsub.f32 %v3160_v14, %v3166_v21 }
0x3a7f   :  { %v3168_v17 = vmul.f32 1.442695, %v3167_v16 }
0x3a81   :  { %3803 = vpow2.f32 %v3168_v17 }
0x3a8e   :  { %v3804_v19 = vpop.eup %3803 }
0x3a8f   :  { %3623 = vmatmul.mubr.msk.f32.vlgmr.msra.gmra.mxu0 %vm1318_vm11, %v3804_v19  ;;  %v3170_v20 = vsel %vm1307_vm10, %v3804_v19, 0.0 }
0x3a90   :  { %3171 = vadd.xlane.f32.xlu1 %v3170_v20 }
0x3b19   :  { %v3172_v24 = vpop.xlane.xlu1 %3171 }
0x3b1a   :  { %3805 = vrcp.f32 %v3172_v24 }
0x3b27   :  { %v3806_v18 = vpop.eup %3805 }
0x3b4f   :  { %v3243_v22 = vpop.f32.mrf.mxu0 }
0x3b50   :  { %v3247_v0 = vmul.f32 %v3806_v18, %v3243_v22 }
0x3b51   :  { %v3624_v23 = vpop.f32.mrf.mxu0 }
0x3b52   :  { %v3248_v25 = vadd.f32 %v3247_v0, %v3080_v5 }
0x3b54   :  { %v3249_v26 = vadd.f32 %v3248_v25, %v4267_v37 }
0x3b56   :  { %3807 = vtanh.f32 %v3249_v26  ;;  %v3374_v27 = vmul.f32 -1.442695, %v3249_v26 }
0x3b58   :  { %3809 = vpow2.f32 %v3374_v27 }
0x3b63   :  { %v3808_v57 = vpop.eup %3807 }
0x3b64   :  { %3259 = vrot.lane.b32.xlu0 %v3808_v57, %s3954_s12 }
0x3b65   :  { %v3810_v28 = vpop.eup %3809 }
0x3b66   :  { %v3253_v29 = vadd.f32 1.0, %v3810_v28 }
0x3b68   :  { %3811 = vrcp.f32 %v3253_v29 }
0x3b75   :  { %v3812_v30 = vpop.eup %3811 }
0x3b76   :  { %v3257_v33 = vmul.f32 %v3812_v30, %v3002_v60 }
0x3bd6   :  { %v3260_v31 = vpop.permute.xlu0 %3259 }
0x3bd7   :  { %v3262_v32 = vmul.f32 %v3812_v30, %v3260_v31 }
0x3bd9   :  { %3264 = vrot.lane.b32.xlu1 %v3262_v32, %s3954_s12 }
0x3c4b   :  { %v3265_v34 = vpop.permute.xlu1 %3264 }
0x3c4c   :  { %v3267_v35 = vadd.f32 %v3265_v34, %v3257_v33 }
0x3c4e   :  { %3813 = vtanh.f32 %v3267_v35 }
0x3c5b   :  { %v3814_v50 = vpop.eup %3813 }
0x3c5c   :  { %3270 = vrot.lane.b32.xlu0 %v3814_v50, %s3954_s12 }
0x3cce   :  { %v3271_v37 = vpop.permute.xlu0 %3270 }
0x3ccf   :  { %v3273_v36 = vmul.f32 %v3812_v30, %v3271_v37 }
0x3cd1   :  { %v3287_v52 = vrot.slane %v3273_v36, 1 }
0x3cd3   :  { %v3295_v54 = vsel %vm1046_vm9, %v3294_v1, %v3287_v52 }
0x3cd4   :  { %3297 = vrot.lane.b32.xlu1 %v3295_v54, %s3955_s3 }
0x3d46   :  { %v3298_v56 = vpop.permute.xlu1 %3297 }
0x3d47   :  { %3300 = vst.msk [vmem:[#allocation11] sm:$0xff] %vm187_vm2, %v3298_v56 }
0x3d48   :  { %3926 = shalt.err (!%p3923_p1)
}
0x3d49   :  { %3310 = dma.vmem_to_hbm [thread:$0]  %s3308_s19, 128, %s4535_s9, [#allocation4]  }
0x3d4a   :  { %3941 = dma.done.wait [#allocation4], 128  }
0x3d4b   :  { %3942 = vsyncadd [#allocation4], 4294967168 }
0x3d4c   :  { %3314 = vsyncpa [#allocation3], 1 }
0x3d4d   :  { %3315 = vsyncpa [#allocation6], 1 }
0x3d4e   :  { %3316 = vsyncpa [#allocation9], 1 }
0x3d4f   :  { %3317 = vsyncpa [#allocation4], 1 }

</bundles_post_ra>
